<compile_context>
chip_gen: v7x
topology: tpu7x:2x2x1
jax: 0.10.0
libtpu: 0.0.40
codegen_flags: <defaults>
</compile_context>

<pallas_src>
import functools

import jax
import jax.numpy as jnp
from jax.experimental import pallas as pl
from jax.experimental.pallas import tpu as pltpu

_LANE = 128


def _pad(v, m=_LANE):
    return ((v + m - 1) // m) * m


def _layernorm(z, gamma, beta, eps=1e-5):
    mu = jnp.mean(z, axis=-1, keepdims=True)
    var = jnp.mean((z - mu) ** 2, axis=-1, keepdims=True)
    return (z - mu) * jax.lax.rsqrt(var + eps) * gamma + beta


def _transformer_block_kernel(
    x_ref,
    wq_ref, bq_ref, wkT_ref, bkT_ref, wv_ref, bv_ref, wo_ref, bo_ref,
    g1_ref, be1_ref,
    w1_ref, bb1_ref, w2_ref, bb2_ref,
    g2_ref, be2_ref,
    o_ref,
    kT_scr, v_scr,
    *, num_heads, head_dim, q_tile, compute_dtype, approx_recip,
):
    f32 = jnp.float32
    cdt = compute_dtype
    H, hd = num_heads, head_dim
    qi = pl.program_id(1)

    # ---- K / V projections: computed once per batch element, cached in VMEM ----
    @pl.when(qi == 0)
    def _():
        xc = x_ref[...].astype(cdt)                                   # (N, D)
        xT = xc.T                                                     # (D, N): one 2-D transpose / batch elem
        # K stored transposed (H, hd, N): lane-dense scratch (N on lanes) and a
        # plain non-transposed-RHS feed for the score matmul below.
        kT = jnp.dot(wkT_ref[...].astype(cdt), xT,
                     preferred_element_type=f32) + bkT_ref[...]       # (D, N)
        kT_scr[...] = kT.astype(cdt).reshape(kT_scr.shape)            # free split of the leading dim
        v = jnp.dot(xc, wv_ref[...].astype(cdt),
                    preferred_element_type=f32) + bv_ref[...]         # (N, D)
        vc = v.astype(cdt)
        for h in range(H):                                            # static slices, once per batch elem
            v_scr[h] = vc[:, h * hd:(h + 1) * hd]

    # ---- Q tile (residual path kept in f32) ----
    q_start = pl.multiple_of(qi * q_tile, q_tile)
    x_t = x_ref[pl.ds(q_start, q_tile), :].astype(f32)                # (TQ, D)
    q = jnp.dot(x_t.astype(cdt), wq_ref[...].astype(cdt),
                preferred_element_type=f32) + bq_ref[...]
    q = q * (hd ** -0.5)                                              # fold softmax scale into Q
    qc = q.astype(cdt)
    # NOTE: head split kept as static slices + stack (known-good lowering); a
    # single lane-aware relayout (pltpu.einshape) is a possible follow-up.
    q3 = jnp.stack([qc[:, h * hd:(h + 1) * hd] for h in range(H)], axis=0)   # (H, TQ, hd)

    # ---- attention: all heads batched on the MXU, K already transposed ----
    s = jnp.einsum("hqd,hdk->hqk", q3, kT_scr[...],
                   preferred_element_type=f32)                        # (H, TQ, N), lane-dense on N
    m = jnp.max(s, axis=-1, keepdims=True)
    p = jnp.exp(s - m)
    denom = jnp.sum(p, axis=-1, keepdims=True)                        # (H, TQ, 1)
    ctx = jnp.einsum("hqk,hkd->hqd", p.astype(cdt), v_scr[...],
                     preferred_element_type=f32)                      # (H, TQ, hd)
    ctx = ctx * pl.reciprocal(denom, approx=approx_recip)             # normalize after PV

    att = jnp.concatenate([ctx[h] for h in range(H)], axis=-1)        # (TQ, D)
    att = jnp.dot(att.astype(cdt), wo_ref[...].astype(cdt),
                  preferred_element_type=f32) + bo_ref[...]

    # ---- residual + norm1 (f32 elementwise) ----
    x1 = _layernorm(att + x_t, g1_ref[...], be1_ref[...])

    # ---- feed forward ----
    h1 = jnp.dot(x1.astype(cdt), w1_ref[...].astype(cdt),
                 preferred_element_type=f32) + bb1_ref[...]
    h1 = jnp.maximum(h1, 0.0)
    ff = jnp.dot(h1.astype(cdt), w2_ref[...].astype(cdt),
                 preferred_element_type=f32) + bb2_ref[...]

    # ---- residual + norm2 ----
    o_ref[...] = _layernorm(ff + x1, g2_ref[...], be2_ref[...]).astype(o_ref.dtype)


def _plan_tiles_and_vmem(N, D, Hm, H, hd, itm_c, itm_x, q_tile):
    """Pick the q-tile size and scoped-VMEM limit from the chip's real capacity."""
    try:
        cap = int(pltpu.get_tpu_info().vmem_capacity_bytes)           # 64 MiB on v7x, 128 MiB v5e/v6e
    except Exception:
        cap = 64 * 1024 * 1024                                        # conservative: valid everywhere

    # Resident, TQ-independent footprint.
    weights = (4 * D * D + 2 * D * Hm) * itm_c                        # single-buffered weights
    kv_scr = H * hd * _pad(N) * itm_c + H * N * _pad(hd) * itm_c      # K^T (lane-dense) + V (lane-padded)
    x_block = 2 * N * _pad(D) * itm_x                                 # double-buffered x block
    fixed = weights + kv_scr + x_block

    def per_tile(tq):
        scores = H * tq * _pad(N) * 4                                 # f32 (H, TQ, N)
        mlp = tq * _pad(Hm) * 4                                       # f32 (TQ, Hm)
        out_blk = 2 * tq * _pad(D) * 4                                # double-buffered output block
        misc = 8 * tq * _pad(D) * 4                                   # q / ctx / att / x1 / residuals
        return scores + mlp + out_blk + misc

    if q_tile is not None:
        tq = min(int(q_tile), N)
        if N % tq != 0:
            tq = N                                                    # no clean split -> single tile
    else:
        budget = int(0.70 * cap)
        cands = sorted({t for t in (512, 256, 128, 64, 32, 16, 8)
                        if t <= N and N % t == 0} | {N}, reverse=True)
        tq = cands[-1]                                                # fallback: smallest candidate
        for t in cands:                                               # largest candidate that fits
            if fixed + per_tile(t) <= budget:
                tq = t
                break

    est = fixed + per_tile(tq)
    limit = min(max(int(1.4 * est), 24 * 1024 * 1024), int(0.85 * cap))
    return tq, limit


def transformer_block(x, params, *, num_heads, compute_dtype=None, q_tile=None,
                      dma_x_in_compute_dtype=False):
    B, N, D = x.shape
    assert D % num_heads == 0, "emb_dim must be divisible by num_heads"
    head_dim = D // num_heads
    Hm = params["w1"].shape[1]                                        # MLP hidden = forward_expansion * D
    out_dtype = x.dtype
    cdt = jnp.dtype(out_dtype) if compute_dtype is None else jnp.dtype(compute_dtype)
    itm_c = jnp.dtype(cdt).itemsize

    # Optionally DMA x in the (narrow) compute dtype -- halves the resident x
    # block and its HBM traffic; residual/LN math stays f32 inside the kernel.
    x_in = x.astype(cdt) if dma_x_in_compute_dtype else x
    itm_x = jnp.dtype(x_in.dtype).itemsize

    TQ, vmem_limit = _plan_tiles_and_vmem(N, D, Hm, num_heads, head_dim, itm_c, itm_x, q_tile)
    nq = N // TQ

    # Cast matmul weights in the wrapper so the DMA'd VMEM tiles are already in
    # the compute dtype; biases / LN params stay f32.  Wk is passed TRANSPOSED
    # (applied from the left: k^T = Wk^T @ x^T), with its bias as a (D, 1) column.
    wq = params["wq"].astype(cdt)
    wkT = params["wk"].T.astype(cdt)
    wv = params["wv"].astype(cdt)
    wo = params["wo"].astype(cdt)
    w1 = params["w1"].astype(cdt)
    w2 = params["w2"].astype(cdt)
    bkT = params["bk"].reshape(D, 1)

    kernel = functools.partial(
        _transformer_block_kernel,
        num_heads=num_heads, head_dim=head_dim, q_tile=TQ, compute_dtype=cdt,
        approx_recip=(cdt != jnp.float32),
    )

    flops = 2 * B * N * (4 * D * D + 2 * D * Hm) + 4 * B * num_heads * N * N * head_dim
    cost = pl.CostEstimate(
        flops=int(flops),
        transcendentals=int(B * num_heads * N * N),
        bytes_accessed=int(B * N * D * (itm_x + jnp.dtype(out_dtype).itemsize)
                           + (4 * D * D + 2 * D * Hm) * itm_c),
    )

    def _call(single_buffer_weights):
        def wspec(shape):
            # Invariant weights: constant index_map; single-buffer them to halve VMEM.
            if single_buffer_weights:
                return pl.BlockSpec(shape, lambda b, qi: (0, 0), pipeline_mode=pl.Buffered(1))
            return pl.BlockSpec(shape, lambda b, qi: (0, 0))

        def pspec(shape):                                            # small params (biases / LN)
            return pl.BlockSpec(shape, lambda b, qi: (0, 0))

        return pl.pallas_call(
            kernel,
            out_shape=jax.ShapeDtypeStruct((B, N, D), out_dtype),
            grid=(B, nq),
            in_specs=[
                pl.BlockSpec((None, N, D), lambda b, qi: (b, 0, 0)),  # x (full seq, per batch elem)
                wspec((D, D)), pspec((1, D)),                         # Wq, bq
                wspec((D, D)), pspec((D, 1)),                         # Wk^T, bk^T
                wspec((D, D)), pspec((1, D)),                         # Wv, bv
                wspec((D, D)), pspec((1, D)),                         # Wo, bo
                pspec((1, D)), pspec((1, D)),                         # norm1 gamma/beta
                wspec((D, Hm)), pspec((1, Hm)),                       # W1, b1
                wspec((Hm, D)), pspec((1, D)),                        # W2, b2
                pspec((1, D)), pspec((1, D)),                         # norm2 gamma/beta
            ],
            out_specs=pl.BlockSpec((None, TQ, D), lambda b, qi: (b, qi, 0)),
            scratch_shapes=[
                pltpu.VMEM((num_heads, head_dim, N), cdt),            # K^T cache (lane-dense on N)
                pltpu.VMEM((num_heads, N, head_dim), cdt),            # V cache
            ],
            compiler_params=pltpu.CompilerParams(
                dimension_semantics=("parallel", "arbitrary"),
                vmem_limit_bytes=vmem_limit,
            ),
            cost_estimate=cost,
        )(
            x_in,
            wq, params["bq"], wkT, bkT, wv, params["bv"], wo, params["bo"],
            params["g1"], params["be1"],
            w1, params["bb1"], w2, params["bb2"],
            params["g2"], params["be2"],
        )

    try:
        return _call(True)
    except Exception:
        # pl.Buffered(1) (single-buffered invariant weights) rejected on this
        # jax version -- fall back to default (double) buffering.
        return _call(False)


def _reference(x, p, num_heads):
    B, N, D = x.shape
    hd = D // num_heads
    q = (x @ p["wq"] + p["bq"]).reshape(B, N, num_heads, hd)
    k = (x @ p["wk"] + p["bk"]).reshape(B, N, num_heads, hd)
    v = (x @ p["wv"] + p["bv"]).reshape(B, N, num_heads, hd)
    qk = jnp.einsum("bqhd,bkhd->bhqk", q, k) / (hd ** 0.5)
    att = jax.nn.softmax(qk, axis=-1)
    out = jnp.einsum("bhqk,bkhd->bqhd", att, v).reshape(B, N, D)
    out = out @ p["wo"] + p["bo"]

    def ln(z, g, b):
        mu = jnp.mean(z, axis=-1, keepdims=True)
        var = jnp.mean((z - mu) ** 2, axis=-1, keepdims=True)
        return (z - mu) / jnp.sqrt(var + 1e-5) * g + b

    x1 = ln(out + x, p["g1"], p["be1"])
    ff = jnp.maximum(x1 @ p["w1"] + p["bb1"], 0.0) @ p["w2"] + p["bb2"]
    return ln(ff + x1, p["g2"], p["be2"])


if __name__ == "__main__":
    # small shapes consistent with the module's forward
    B, N, D = 2, 8, 32
    num_heads = 4
    forward_expansion = 4
    Hm = forward_expansion * D

    key = jax.random.PRNGKey(0)
    keys = jax.random.split(key, 13)
    init = lambda k, shape: (0.02 * jax.random.normal(k, shape)).astype(jnp.float32)

    params = {
        # attention projections (stored as (in, out) so kernel computes x @ W + b)
        "wq": init(keys[0], (D, D)), "bq": init(keys[1], (1, D)),
        "wk": init(keys[2], (D, D)), "bk": init(keys[3], (1, D)),
        "wv": init(keys[4], (D, D)), "bv": init(keys[5], (1, D)),
        "wo": init(keys[6], (D, D)), "bo": init(keys[7], (1, D)),
        # layernorms (PyTorch default init: gamma=1, beta=0)
        "g1": jnp.ones((1, D), jnp.float32), "be1": jnp.zeros((1, D), jnp.float32),
        "g2": jnp.ones((1, D), jnp.float32), "be2": jnp.zeros((1, D), jnp.float32),
        # feed forward
        "w1": init(keys[8], (D, Hm)), "bb1": init(keys[9], (1, Hm)),
        "w2": init(keys[10], (Hm, D)), "bb2": init(keys[11], (1, D)),
    }

    x = jax.random.normal(keys[12], (B, N, D), dtype=jnp.float32)
    ref = _reference(x, params, num_heads)

    # f32-matmul path (exact softmax normalization).
    out = jax.block_until_ready(transformer_block(x, params, num_heads=num_heads))
    assert out.shape == (B, N, D)
    assert jnp.allclose(out, ref, rtol=2e-3, atol=2e-3), "f32 path mismatch vs reference"

    # bf16-matmul / f32-accumulate path with x DMA'd in bf16 (deployment config).
    out_bf16 = jax.block_until_ready(
        transformer_block(x, params, num_heads=num_heads,
                          compute_dtype=jnp.bfloat16, dma_x_in_compute_dtype=True))
    assert out_bf16.shape == (B, N, D)
    assert jnp.allclose(out_bf16, ref, rtol=3e-2, atol=3e-2), "bf16 path mismatch vs reference"

    print("KERNEL_OK")
</pallas_src>

<mosaic_0001>
module attributes {stable_mosaic.version = 11 : i64} {
  func.func @_transformer_block_kernel(%arg0: i32, %arg1: i32, %arg2: memref<1x8x32xf32, #tpu.memory_space<vmem>>, %arg3: memref<32x32xf32, #tpu.memory_space<vmem>>, %arg4: memref<1x32xf32, #tpu.memory_space<vmem>>, %arg5: memref<32x32xf32, #tpu.memory_space<vmem>>, %arg6: memref<32x1xf32, #tpu.memory_space<vmem>>, %arg7: memref<32x32xf32, #tpu.memory_space<vmem>>, %arg8: memref<1x32xf32, #tpu.memory_space<vmem>>, %arg9: memref<32x32xf32, #tpu.memory_space<vmem>>, %arg10: memref<1x32xf32, #tpu.memory_space<vmem>>, %arg11: memref<1x32xf32, #tpu.memory_space<vmem>>, %arg12: memref<1x32xf32, #tpu.memory_space<vmem>>, %arg13: memref<32x128xf32, #tpu.memory_space<vmem>>, %arg14: memref<1x128xf32, #tpu.memory_space<vmem>>, %arg15: memref<128x32xf32, #tpu.memory_space<vmem>>, %arg16: memref<1x32xf32, #tpu.memory_space<vmem>>, %arg17: memref<1x32xf32, #tpu.memory_space<vmem>>, %arg18: memref<1x32xf32, #tpu.memory_space<vmem>>, %arg19: memref<1x8x32xf32, #tpu.memory_space<vmem>>, %arg20: memref<4x8x8xf32, #tpu.memory_space<vmem>>, %arg21: memref<4x8x8xf32, #tpu.memory_space<vmem>>) attributes {dimension_semantics = [#tpu.dimension_semantics<parallel>, #tpu.dimension_semantics<arbitrary>], iteration_bounds = array<i64: 2, 1>, scalar_prefetch = 0 : i64, scratch_operands = 2 : i64, tpu.core_type = #tpu.core_type<tc>, window_params = [{transform_indices = @transform_0, window_bounds = array<i64: 1, 8, 32>}, {pipeline_mode = #tpu.pipeline_mode<synchronous>, transform_indices = @transform_1, window_bounds = array<i64: 32, 32>}, {pipeline_mode = #tpu.pipeline_mode<synchronous>, transform_indices = @transform_2, window_bounds = array<i64: 1, 32>}, {pipeline_mode = #tpu.pipeline_mode<synchronous>, transform_indices = @transform_3, window_bounds = array<i64: 32, 32>}, {pipeline_mode = #tpu.pipeline_mode<synchronous>, transform_indices = @transform_4, window_bounds = array<i64: 32, 1>}, {pipeline_mode = #tpu.pipeline_mode<synchronous>, transform_indices = @transform_5, window_bounds = array<i64: 32, 32>}, {pipeline_mode = #tpu.pipeline_mode<synchronous>, transform_indices = @transform_6, window_bounds = array<i64: 1, 32>}, {pipeline_mode = #tpu.pipeline_mode<synchronous>, transform_indices = @transform_7, window_bounds = array<i64: 32, 32>}, {pipeline_mode = #tpu.pipeline_mode<synchronous>, transform_indices = @transform_8, window_bounds = array<i64: 1, 32>}, {pipeline_mode = #tpu.pipeline_mode<synchronous>, transform_indices = @transform_9, window_bounds = array<i64: 1, 32>}, {pipeline_mode = #tpu.pipeline_mode<synchronous>, transform_indices = @transform_10, window_bounds = array<i64: 1, 32>}, {pipeline_mode = #tpu.pipeline_mode<synchronous>, transform_indices = @transform_11, window_bounds = array<i64: 32, 128>}, {pipeline_mode = #tpu.pipeline_mode<synchronous>, transform_indices = @transform_12, window_bounds = array<i64: 1, 128>}, {pipeline_mode = #tpu.pipeline_mode<synchronous>, transform_indices = @transform_13, window_bounds = array<i64: 128, 32>}, {pipeline_mode = #tpu.pipeline_mode<synchronous>, transform_indices = @transform_14, window_bounds = array<i64: 1, 32>}, {pipeline_mode = #tpu.pipeline_mode<synchronous>, transform_indices = @transform_15, window_bounds = array<i64: 1, 32>}, {pipeline_mode = #tpu.pipeline_mode<synchronous>, transform_indices = @transform_16, window_bounds = array<i64: 1, 32>}, {transform_indices = @transform_17, window_bounds = array<i64: 1, 8, 32>}]} {
    %c0_i32 = arith.constant 0 : i32
    %0 = arith.cmpi eq, %arg1, %c0_i32 : i32
    %1 = arith.extui %0 : i1 to i32
    %c0_i32_0 = arith.constant 0 : i32
    %2 = arith.cmpi ne, %1, %c0_i32_0 : i32
    scf.if %2 {
      %c0_54 = arith.constant 0 : index
      %c0_55 = arith.constant 0 : index
      %c0_56 = arith.constant 0 : index
      %117 = vector.load %arg2[%c0_54, %c0_55, %c0_56] : memref<1x8x32xf32, #tpu.memory_space<vmem>>, vector<1x8x32xf32>
      %118 = vector.shape_cast %117 : vector<1x8x32xf32> to vector<8x32xf32>
      %119 = tpu.transpose %118, [1, 0] : vector<8x32xf32> -> vector<32x8xf32>
      %c0_57 = arith.constant 0 : index
      %c0_58 = arith.constant 0 : index
      %120 = vector.load %arg5[%c0_57, %c0_58] : memref<32x32xf32, #tpu.memory_space<vmem>>, vector<32x32xf32>
      %cst_59 = arith.constant dense<0.000000e+00> : vector<32x8xf32>
      %121 = tpu.matmul %120, %119, %cst_59 {dimension_numbers = #tpu.dot_dimension_numbers<[1], [0], [0], [1], [0, 0, 1, 1], [], []>} : vector<32x32xf32>, vector<32x8xf32>, vector<32x8xf32> -> vector<32x8xf32>
      %c0_60 = arith.constant 0 : index
      %c0_61 = arith.constant 0 : index
      %122 = vector.load %arg6[%c0_60, %c0_61] : memref<32x1xf32, #tpu.memory_space<vmem>>, vector<32x1xf32>
      %123 = vector.broadcast %122 : vector<32x1xf32> to vector<32x8xf32>
      %124 = arith.addf %121, %123 : vector<32x8xf32>
      %125 = vector.shape_cast %124 : vector<32x8xf32> to vector<4x8x8xf32>
      %c0_62 = arith.constant 0 : index
      %c0_63 = arith.constant 0 : index
      %c0_64 = arith.constant 0 : index
      %126 = vector.load %arg20[%c0_62, %c0_63, %c0_64] : memref<4x8x8xf32, #tpu.memory_space<vmem>>, vector<4x8x8xf32>
      tpu.vector_store %arg20[%c0_62, %c0_63, %c0_64], %125 {strides = array<i32>} : memref<4x8x8xf32, #tpu.memory_space<vmem>>, vector<4x8x8xf32>,
      %c0_65 = arith.constant 0 : index
      %c0_66 = arith.constant 0 : index
      %127 = vector.load %arg7[%c0_65, %c0_66] : memref<32x32xf32, #tpu.memory_space<vmem>>, vector<32x32xf32>
      %cst_67 = arith.constant dense<0.000000e+00> : vector<8x32xf32>
      %128 = tpu.matmul %118, %127, %cst_67 {dimension_numbers = #tpu.dot_dimension_numbers<[1], [0], [0], [1], [0, 0, 1, 1], [], []>} : vector<8x32xf32>, vector<32x32xf32>, vector<8x32xf32> -> vector<8x32xf32>
      %c0_68 = arith.constant 0 : index
      %c0_69 = arith.constant 0 : index
      %129 = vector.load %arg8[%c0_68, %c0_69] : memref<1x32xf32, #tpu.memory_space<vmem>>, vector<1x32xf32>
      %130 = vector.broadcast %129 : vector<1x32xf32> to vector<8x32xf32>
      %131 = arith.addf %128, %130 : vector<8x32xf32>
      %132 = vector.extract_strided_slice %131 {offsets = [0, 0], sizes = [8, 8], strides = [1, 1]} : vector<8x32xf32> to vector<8x8xf32>
      %c0_70 = arith.constant 0 : index
      %c0_71 = arith.constant 0 : index
      %c0_72 = arith.constant 0 : index
      %133 = vector.load %arg21[%c0_70, %c0_71, %c0_72] : memref<4x8x8xf32, #tpu.memory_space<vmem>>, vector<1x8x8xf32>
      %134 = vector.shape_cast %133 : vector<1x8x8xf32> to vector<8x8xf32>
      %135 = vector.shape_cast %132 : vector<8x8xf32> to vector<1x8x8xf32>
      tpu.vector_store %arg21[%c0_70, %c0_71, %c0_72], %135 {strides = array<i32>} : memref<4x8x8xf32, #tpu.memory_space<vmem>>, vector<1x8x8xf32>,
      %136 = vector.extract_strided_slice %131 {offsets = [0, 8], sizes = [8, 8], strides = [1, 1]} : vector<8x32xf32> to vector<8x8xf32>
      %c1 = arith.constant 1 : index
      %c0_73 = arith.constant 0 : index
      %c0_74 = arith.constant 0 : index
      %137 = vector.load %arg21[%c1, %c0_73, %c0_74] : memref<4x8x8xf32, #tpu.memory_space<vmem>>, vector<1x8x8xf32>
      %138 = vector.shape_cast %137 : vector<1x8x8xf32> to vector<8x8xf32>
      %139 = vector.shape_cast %136 : vector<8x8xf32> to vector<1x8x8xf32>
      tpu.vector_store %arg21[%c1, %c0_73, %c0_74], %139 {strides = array<i32>} : memref<4x8x8xf32, #tpu.memory_space<vmem>>, vector<1x8x8xf32>,
      %140 = vector.extract_strided_slice %131 {offsets = [0, 16], sizes = [8, 8], strides = [1, 1]} : vector<8x32xf32> to vector<8x8xf32>
      %c2 = arith.constant 2 : index
      %c0_75 = arith.constant 0 : index
      %c0_76 = arith.constant 0 : index
      %141 = vector.load %arg21[%c2, %c0_75, %c0_76] : memref<4x8x8xf32, #tpu.memory_space<vmem>>, vector<1x8x8xf32>
      %142 = vector.shape_cast %141 : vector<1x8x8xf32> to vector<8x8xf32>
      %143 = vector.shape_cast %140 : vector<8x8xf32> to vector<1x8x8xf32>
      tpu.vector_store %arg21[%c2, %c0_75, %c0_76], %143 {strides = array<i32>} : memref<4x8x8xf32, #tpu.memory_space<vmem>>, vector<1x8x8xf32>,
      %144 = vector.extract_strided_slice %131 {offsets = [0, 24], sizes = [8, 8], strides = [1, 1]} : vector<8x32xf32> to vector<8x8xf32>
      %c3 = arith.constant 3 : index
      %c0_77 = arith.constant 0 : index
      %c0_78 = arith.constant 0 : index
      %145 = vector.load %arg21[%c3, %c0_77, %c0_78] : memref<4x8x8xf32, #tpu.memory_space<vmem>>, vector<1x8x8xf32>
      %146 = vector.shape_cast %145 : vector<1x8x8xf32> to vector<8x8xf32>
      %147 = vector.shape_cast %144 : vector<8x8xf32> to vector<1x8x8xf32>
      tpu.vector_store %arg21[%c3, %c0_77, %c0_78], %147 {strides = array<i32>} : memref<4x8x8xf32, #tpu.memory_space<vmem>>, vector<1x8x8xf32>,
    } else {
    }
    %c8_i32 = arith.constant 8 : i32
    %3 = arith.muli %arg1, %c8_i32 : i32
    %4 = tpu.assume_multiple %3, 8 : i32
    %c0 = arith.constant 0 : index
    %5 = arith.index_cast %4 : i32 to index
    %c0_1 = arith.constant 0 : index
    %6 = vector.load %arg2[%c0, %5, %c0_1] : memref<1x8x32xf32, #tpu.memory_space<vmem>>, vector<1x8x32xf32>
    %7 = vector.shape_cast %6 : vector<1x8x32xf32> to vector<8x32xf32>
    %c0_2 = arith.constant 0 : index
    %c0_3 = arith.constant 0 : index
    %8 = vector.load %arg3[%c0_2, %c0_3] : memref<32x32xf32, #tpu.memory_space<vmem>>, vector<32x32xf32>
    %cst = arith.constant dense<0.000000e+00> : vector<8x32xf32>
    %9 = tpu.matmul %7, %8, %cst {dimension_numbers = #tpu.dot_dimension_numbers<[1], [0], [0], [1], [0, 0, 1, 1], [], []>} : vector<8x32xf32>, vector<32x32xf32>, vector<8x32xf32> -> vector<8x32xf32>
    %c0_4 = arith.constant 0 : index
    %c0_5 = arith.constant 0 : index
    %10 = vector.load %arg4[%c0_4, %c0_5] : memref<1x32xf32, #tpu.memory_space<vmem>>, vector<1x32xf32>
    %11 = vector.broadcast %10 : vector<1x32xf32> to vector<8x32xf32>
    %12 = arith.addf %9, %11 : vector<8x32xf32>
    %cst_6 = arith.constant 0.353553385 : f32
    %13 = vector.broadcast %cst_6 : f32 to vector<8x32xf32>
    %14 = arith.mulf %12, %13 : vector<8x32xf32>
    %15 = vector.extract_strided_slice %14 {offsets = [0, 0], sizes = [8, 8], strides = [1, 1]} : vector<8x32xf32> to vector<8x8xf32>
    %16 = vector.extract_strided_slice %14 {offsets = [0, 8], sizes = [8, 8], strides = [1, 1]} : vector<8x32xf32> to vector<8x8xf32>
    %17 = vector.extract_strided_slice %14 {offsets = [0, 16], sizes = [8, 8], strides = [1, 1]} : vector<8x32xf32> to vector<8x8xf32>
    %18 = vector.extract_strided_slice %14 {offsets = [0, 24], sizes = [8, 8], strides = [1, 1]} : vector<8x32xf32> to vector<8x8xf32>
    %19 = vector.shape_cast %15 : vector<8x8xf32> to vector<1x8x8xf32>
    %20 = vector.shape_cast %16 : vector<8x8xf32> to vector<1x8x8xf32>
    %21 = vector.shape_cast %17 : vector<8x8xf32> to vector<1x8x8xf32>
    %22 = vector.shape_cast %18 : vector<8x8xf32> to vector<1x8x8xf32>
    %23 = tpu.concatenate %19, %20, %21, %22 in 0 : vector<1x8x8xf32>, vector<1x8x8xf32>, vector<1x8x8xf32>, vector<1x8x8xf32> -> vector<4x8x8xf32>
    %c0_7 = arith.constant 0 : index
    %c0_8 = arith.constant 0 : index
    %c0_9 = arith.constant 0 : index
    %24 = vector.load %arg20[%c0_7, %c0_8, %c0_9] : memref<4x8x8xf32, #tpu.memory_space<vmem>>, vector<4x8x8xf32>
    "tpu.trace_start"() <{level = 10 : i32, message = "hqd,hdk->hqk"}> : () -> ()
    %cst_10 = arith.constant dense<0.000000e+00> : vector<4x8x8xf32>
    %25 = tpu.matmul %23, %24, %cst_10 {dimension_numbers = #tpu.dot_dimension_numbers<[2], [1], [1], [2], [0, 0, 0, 1, 1, 2], [0], [0]>} : vector<4x8x8xf32>, vector<4x8x8xf32>, vector<4x8x8xf32> -> vector<4x8x8xf32>
    "tpu.trace_stop"() : () -> ()
    %cst_11 = arith.constant dense<0xFF800000> : vector<4x8xf32>
    %26 = vector.multi_reduction <maximumf>, %25, %cst_11 [2] : vector<4x8x8xf32> to vector<4x8xf32>
    %27 = vector.shape_cast %26 : vector<4x8xf32> to vector<4x8x1xf32>
    %28 = vector.broadcast %27 : vector<4x8x1xf32> to vector<4x8x8xf32>
    %29 = arith.subf %25, %28 : vector<4x8x8xf32>
    %30 = math.exp %29 : vector<4x8x8xf32>
    %cst_12 = arith.constant dense<0.000000e+00> : vector<4x8xf32>
    %31 = vector.multi_reduction <add>, %30, %cst_12 [2] : vector<4x8x8xf32> to vector<4x8xf32>
    %32 = vector.shape_cast %31 : vector<4x8xf32> to vector<4x8x1xf32>
    %c0_13 = arith.constant 0 : index
    %c0_14 = arith.constant 0 : index
    %c0_15 = arith.constant 0 : index
    %33 = vector.load %arg21[%c0_13, %c0_14, %c0_15] : memref<4x8x8xf32, #tpu.memory_space<vmem>>, vector<4x8x8xf32>
    "tpu.trace_start"() <{level = 10 : i32, message = "hqk,hkd->hqd"}> : () -> ()
    %cst_16 = arith.constant dense<0.000000e+00> : vector<4x8x8xf32>
    %34 = tpu.matmul %30, %33, %cst_16 {dimension_numbers = #tpu.dot_dimension_numbers<[2], [1], [1], [2], [0, 0, 0, 1, 1, 2], [0], [0]>} : vector<4x8x8xf32>, vector<4x8x8xf32>, vector<4x8x8xf32> -> vector<4x8x8xf32>
    "tpu.trace_stop"() : () -> ()
    %35 = tpu.reciprocal %32 : vector<4x8x1xf32> -> vector<4x8x1xf32>
    %36 = vector.broadcast %35 : vector<4x8x1xf32> to vector<4x8x8xf32>
    %37 = arith.mulf %34, %36 : vector<4x8x8xf32>
    %38 = vector.extract_strided_slice %37 {offsets = [0, 0, 0], sizes = [1, 8, 8], strides = [1, 1, 1]} : vector<4x8x8xf32> to vector<1x8x8xf32>
    %39 = vector.shape_cast %38 : vector<1x8x8xf32> to vector<8x8xf32>
    %40 = vector.extract_strided_slice %37 {offsets = [1, 0, 0], sizes = [1, 8, 8], strides = [1, 1, 1]} : vector<4x8x8xf32> to vector<1x8x8xf32>
    %41 = vector.shape_cast %40 : vector<1x8x8xf32> to vector<8x8xf32>
    %42 = vector.extract_strided_slice %37 {offsets = [2, 0, 0], sizes = [1, 8, 8], strides = [1, 1, 1]} : vector<4x8x8xf32> to vector<1x8x8xf32>
    %43 = vector.shape_cast %42 : vector<1x8x8xf32> to vector<8x8xf32>
    %44 = vector.extract_strided_slice %37 {offsets = [3, 0, 0], sizes = [1, 8, 8], strides = [1, 1, 1]} : vector<4x8x8xf32> to vector<1x8x8xf32>
    %45 = vector.shape_cast %44 : vector<1x8x8xf32> to vector<8x8xf32>
    %46 = tpu.concatenate %39, %41, %43, %45 in 1 : vector<8x8xf32>, vector<8x8xf32>, vector<8x8xf32>, vector<8x8xf32> -> vector<8x32xf32>
    %c0_17 = arith.constant 0 : index
    %c0_18 = arith.constant 0 : index
    %47 = vector.load %arg9[%c0_17, %c0_18] : memref<32x32xf32, #tpu.memory_space<vmem>>, vector<32x32xf32>
    %cst_19 = arith.constant dense<0.000000e+00> : vector<8x32xf32>
    %48 = tpu.matmul %46, %47, %cst_19 {dimension_numbers = #tpu.dot_dimension_numbers<[1], [0], [0], [1], [0, 0, 1, 1], [], []>} : vector<8x32xf32>, vector<32x32xf32>, vector<8x32xf32> -> vector<8x32xf32>
    %c0_20 = arith.constant 0 : index
    %c0_21 = arith.constant 0 : index
    %49 = vector.load %arg10[%c0_20, %c0_21] : memref<1x32xf32, #tpu.memory_space<vmem>>, vector<1x32xf32>
    %50 = vector.broadcast %49 : vector<1x32xf32> to vector<8x32xf32>
    %51 = arith.addf %48, %50 : vector<8x32xf32>
    %52 = arith.addf %51, %7 : vector<8x32xf32>
    %c0_22 = arith.constant 0 : index
    %c0_23 = arith.constant 0 : index
    %53 = vector.load %arg11[%c0_22, %c0_23] : memref<1x32xf32, #tpu.memory_space<vmem>>, vector<1x32xf32>
    %c0_24 = arith.constant 0 : index
    %c0_25 = arith.constant 0 : index
    %54 = vector.load %arg12[%c0_24, %c0_25] : memref<1x32xf32, #tpu.memory_space<vmem>>, vector<1x32xf32>
    %cst_26 = arith.constant dense<0.000000e+00> : vector<8xf32>
    %55 = vector.multi_reduction <add>, %52, %cst_26 [1] : vector<8x32xf32> to vector<8xf32>
    %56 = vector.shape_cast %55 : vector<8xf32> to vector<8x1xf32>
    %cst_27 = arith.constant 3.200000e+01 : f32
    %57 = vector.broadcast %cst_27 : f32 to vector<8x1xf32>
    %58 = arith.divf %56, %57 : vector<8x1xf32>
    %59 = vector.broadcast %58 : vector<8x1xf32> to vector<8x32xf32>
    %60 = arith.subf %52, %59 : vector<8x32xf32>
    %61 = arith.mulf %60, %60 : vector<8x32xf32>
    %cst_28 = arith.constant dense<0.000000e+00> : vector<8xf32>
    %62 = vector.multi_reduction <add>, %61, %cst_28 [1] : vector<8x32xf32> to vector<8xf32>
    %63 = vector.shape_cast %62 : vector<8xf32> to vector<8x1xf32>
    %cst_29 = arith.constant 3.200000e+01 : f32
    %64 = vector.broadcast %cst_29 : f32 to vector<8x1xf32>
    %65 = arith.divf %63, %64 : vector<8x1xf32>
    %66 = vector.broadcast %58 : vector<8x1xf32> to vector<8x32xf32>
    %67 = arith.subf %52, %66 : vector<8x32xf32>
    %cst_30 = arith.constant 9.99999974E-6 : f32
    %68 = vector.broadcast %cst_30 : f32 to vector<8x1xf32>
    %69 = arith.addf %65, %68 : vector<8x1xf32>
    %70 = math.rsqrt %69 : vector<8x1xf32>
    %71 = vector.broadcast %70 : vector<8x1xf32> to vector<8x32xf32>
    %72 = arith.mulf %67, %71 : vector<8x32xf32>
    %73 = vector.broadcast %53 : vector<1x32xf32> to vector<8x32xf32>
    %74 = arith.mulf %72, %73 : vector<8x32xf32>
    %75 = vector.broadcast %54 : vector<1x32xf32> to vector<8x32xf32>
    %76 = arith.addf %74, %75 : vector<8x32xf32>
    %c0_31 = arith.constant 0 : index
    %c0_32 = arith.constant 0 : index
    %77 = vector.load %arg13[%c0_31, %c0_32] : memref<32x128xf32, #tpu.memory_space<vmem>>, vector<32x128xf32>
    %cst_33 = arith.constant dense<0.000000e+00> : vector<8x128xf32>
    %78 = tpu.matmul %76, %77, %cst_33 {dimension_numbers = #tpu.dot_dimension_numbers<[1], [0], [0], [1], [0, 0, 1, 1], [], []>} : vector<8x32xf32>, vector<32x128xf32>, vector<8x128xf32> -> vector<8x128xf32>
    %c0_34 = arith.constant 0 : index
    %c0_35 = arith.constant 0 : index
    %79 = vector.load %arg14[%c0_34, %c0_35] : memref<1x128xf32, #tpu.memory_space<vmem>>, vector<1x128xf32>
    %80 = vector.broadcast %79 : vector<1x128xf32> to vector<8x128xf32>
    %81 = arith.addf %78, %80 : vector<8x128xf32>
    %cst_36 = arith.constant 0.000000e+00 : f32
    %82 = vector.broadcast %cst_36 : f32 to vector<8x128xf32>
    %83 = arith.maximumf %81, %82 : vector<8x128xf32>
    %c0_37 = arith.constant 0 : index
    %c0_38 = arith.constant 0 : index
    %84 = vector.load %arg15[%c0_37, %c0_38] : memref<128x32xf32, #tpu.memory_space<vmem>>, vector<128x32xf32>
    %cst_39 = arith.constant dense<0.000000e+00> : vector<8x32xf32>
    %85 = tpu.matmul %83, %84, %cst_39 {dimension_numbers = #tpu.dot_dimension_numbers<[1], [0], [0], [1], [0, 0, 1, 1], [], []>} : vector<8x128xf32>, vector<128x32xf32>, vector<8x32xf32> -> vector<8x32xf32>
    %c0_40 = arith.constant 0 : index
    %c0_41 = arith.constant 0 : index
    %86 = vector.load %arg16[%c0_40, %c0_41] : memref<1x32xf32, #tpu.memory_space<vmem>>, vector<1x32xf32>
    %87 = vector.broadcast %86 : vector<1x32xf32> to vector<8x32xf32>
    %88 = arith.addf %85, %87 : vector<8x32xf32>
    %89 = arith.addf %88, %76 : vector<8x32xf32>
    %c0_42 = arith.constant 0 : index
    %c0_43 = arith.constant 0 : index
    %90 = vector.load %arg17[%c0_42, %c0_43] : memref<1x32xf32, #tpu.memory_space<vmem>>, vector<1x32xf32>
    %c0_44 = arith.constant 0 : index
    %c0_45 = arith.constant 0 : index
    %91 = vector.load %arg18[%c0_44, %c0_45] : memref<1x32xf32, #tpu.memory_space<vmem>>, vector<1x32xf32>
    %cst_46 = arith.constant dense<0.000000e+00> : vector<8xf32>
    %92 = vector.multi_reduction <add>, %89, %cst_46 [1] : vector<8x32xf32> to vector<8xf32>
    %93 = vector.shape_cast %92 : vector<8xf32> to vector<8x1xf32>
    %cst_47 = arith.constant 3.200000e+01 : f32
    %94 = vector.broadcast %cst_47 : f32 to vector<8x1xf32>
    %95 = arith.divf %93, %94 : vector<8x1xf32>
    %96 = vector.broadcast %95 : vector<8x1xf32> to vector<8x32xf32>
    %97 = arith.subf %89, %96 : vector<8x32xf32>
    %98 = arith.mulf %97, %97 : vector<8x32xf32>
    %cst_48 = arith.constant dense<0.000000e+00> : vector<8xf32>
    %99 = vector.multi_reduction <add>, %98, %cst_48 [1] : vector<8x32xf32> to vector<8xf32>
    %100 = vector.shape_cast %99 : vector<8xf32> to vector<8x1xf32>
    %cst_49 = arith.constant 3.200000e+01 : f32
    %101 = vector.broadcast %cst_49 : f32 to vector<8x1xf32>
    %102 = arith.divf %100, %101 : vector<8x1xf32>
    %103 = vector.broadcast %95 : vector<8x1xf32> to vector<8x32xf32>
    %104 = arith.subf %89, %103 : vector<8x32xf32>
    %cst_50 = arith.constant 9.99999974E-6 : f32
    %105 = vector.broadcast %cst_50 : f32 to vector<8x1xf32>
    %106 = arith.addf %102, %105 : vector<8x1xf32>
    %107 = math.rsqrt %106 : vector<8x1xf32>
    %108 = vector.broadcast %107 : vector<8x1xf32> to vector<8x32xf32>
    %109 = arith.mulf %104, %108 : vector<8x32xf32>
    %110 = vector.broadcast %90 : vector<1x32xf32> to vector<8x32xf32>
    %111 = arith.mulf %109, %110 : vector<8x32xf32>
    %112 = vector.broadcast %91 : vector<1x32xf32> to vector<8x32xf32>
    %113 = arith.addf %111, %112 : vector<8x32xf32>
    %c0_51 = arith.constant 0 : index
    %c0_52 = arith.constant 0 : index
    %c0_53 = arith.constant 0 : index
    %114 = vector.load %arg19[%c0_51, %c0_52, %c0_53] : memref<1x8x32xf32, #tpu.memory_space<vmem>>, vector<1x8x32xf32>
    %115 = vector.shape_cast %114 : vector<1x8x32xf32> to vector<8x32xf32>
    %116 = vector.shape_cast %113 : vector<8x32xf32> to vector<1x8x32xf32>
    tpu.vector_store %arg19[%c0_51, %c0_52, %c0_53], %116 {strides = array<i32>} : memref<1x8x32xf32, #tpu.memory_space<vmem>>, vector<1x8x32xf32>,
    return
  }
  func.func @transform_0(%arg0: i32, %arg1: i32) -> (i32, i32, i32) {
    %c0_i32 = arith.constant 0 : i32
    %c0_i32_0 = arith.constant 0 : i32
    %c0_i32_1 = arith.constant 0 : i32
    return %arg0, %c0_i32, %c0_i32_0 : i32, i32, i32
  }
  func.func @transform_1(%arg0: i32, %arg1: i32) -> (i32, i32) {
    %c0_i32 = arith.constant 0 : i32
    %c0_i32_0 = arith.constant 0 : i32
    %c0_i32_1 = arith.constant 0 : i32
    return %c0_i32, %c0_i32_0 : i32, i32
  }
  func.func @transform_2(%arg0: i32, %arg1: i32) -> (i32, i32) {
    %c0_i32 = arith.constant 0 : i32
    %c0_i32_0 = arith.constant 0 : i32
    %c0_i32_1 = arith.constant 0 : i32
    return %c0_i32, %c0_i32_0 : i32, i32
  }
  func.func @transform_3(%arg0: i32, %arg1: i32) -> (i32, i32) {
    %c0_i32 = arith.constant 0 : i32
    %c0_i32_0 = arith.constant 0 : i32
    %c0_i32_1 = arith.constant 0 : i32
    return %c0_i32, %c0_i32_0 : i32, i32
  }
  func.func @transform_4(%arg0: i32, %arg1: i32) -> (i32, i32) {
    %c0_i32 = arith.constant 0 : i32
    %c0_i32_0 = arith.constant 0 : i32
    %c0_i32_1 = arith.constant 0 : i32
    return %c0_i32, %c0_i32_0 : i32, i32
  }
  func.func @transform_5(%arg0: i32, %arg1: i32) -> (i32, i32) {
    %c0_i32 = arith.constant 0 : i32
    %c0_i32_0 = arith.constant 0 : i32
    %c0_i32_1 = arith.constant 0 : i32
    return %c0_i32, %c0_i32_0 : i32, i32
  }
  func.func @transform_6(%arg0: i32, %arg1: i32) -> (i32, i32) {
    %c0_i32 = arith.constant 0 : i32
    %c0_i32_0 = arith.constant 0 : i32
    %c0_i32_1 = arith.constant 0 : i32
    return %c0_i32, %c0_i32_0 : i32, i32
  }
  func.func @transform_7(%arg0: i32, %arg1: i32) -> (i32, i32) {
    %c0_i32 = arith.constant 0 : i32
    %c0_i32_0 = arith.constant 0 : i32
    %c0_i32_1 = arith.constant 0 : i32
    return %c0_i32, %c0_i32_0 : i32, i32
  }
  func.func @transform_8(%arg0: i32, %arg1: i32) -> (i32, i32) {
    %c0_i32 = arith.constant 0 : i32
    %c0_i32_0 = arith.constant 0 : i32
    %c0_i32_1 = arith.constant 0 : i32
    return %c0_i32, %c0_i32_0 : i32, i32
  }
  func.func @transform_9(%arg0: i32, %arg1: i32) -> (i32, i32) {
    %c0_i32 = arith.constant 0 : i32
    %c0_i32_0 = arith.constant 0 : i32
    %c0_i32_1 = arith.constant 0 : i32
    return %c0_i32, %c0_i32_0 : i32, i32
  }
  func.func @transform_10(%arg0: i32, %arg1: i32) -> (i32, i32) {
    %c0_i32 = arith.constant 0 : i32
    %c0_i32_0 = arith.constant 0 : i32
    %c0_i32_1 = arith.constant 0 : i32
    return %c0_i32, %c0_i32_0 : i32, i32
  }
  func.func @transform_11(%arg0: i32, %arg1: i32) -> (i32, i32) {
    %c0_i32 = arith.constant 0 : i32
    %c0_i32_0 = arith.constant 0 : i32
    %c0_i32_1 = arith.constant 0 : i32
    return %c0_i32, %c0_i32_0 : i32, i32
  }
  func.func @transform_12(%arg0: i32, %arg1: i32) -> (i32, i32) {
    %c0_i32 = arith.constant 0 : i32
    %c0_i32_0 = arith.constant 0 : i32
    %c0_i32_1 = arith.constant 0 : i32
    return %c0_i32, %c0_i32_0 : i32, i32
  }
  func.func @transform_13(%arg0: i32, %arg1: i32) -> (i32, i32) {
    %c0_i32 = arith.constant 0 : i32
    %c0_i32_0 = arith.constant 0 : i32
    %c0_i32_1 = arith.constant 0 : i32
    return %c0_i32, %c0_i32_0 : i32, i32
  }
  func.func @transform_14(%arg0: i32, %arg1: i32) -> (i32, i32) {
    %c0_i32 = arith.constant 0 : i32
    %c0_i32_0 = arith.constant 0 : i32
    %c0_i32_1 = arith.constant 0 : i32
    return %c0_i32, %c0_i32_0 : i32, i32
  }
  func.func @transform_15(%arg0: i32, %arg1: i32) -> (i32, i32) {
    %c0_i32 = arith.constant 0 : i32
    %c0_i32_0 = arith.constant 0 : i32
    %c0_i32_1 = arith.constant 0 : i32
    return %c0_i32, %c0_i32_0 : i32, i32
  }
  func.func @transform_16(%arg0: i32, %arg1: i32) -> (i32, i32) {
    %c0_i32 = arith.constant 0 : i32
    %c0_i32_0 = arith.constant 0 : i32
    %c0_i32_1 = arith.constant 0 : i32
    return %c0_i32, %c0_i32_0 : i32, i32
  }
  func.func @transform_17(%arg0: i32, %arg1: i32) -> (i32, i32, i32) {
    %c0_i32 = arith.constant 0 : i32
    %c0_i32_0 = arith.constant 0 : i32
    return %arg0, %arg1, %c0_i32 : i32, i32, i32
  }
}

module attributes {stable_mosaic.version = 11 : i64} {
  func.func @_transformer_block_kernel(%arg0: i32, %arg1: i32, %arg2: memref<1x8x32xf32, #tpu.memory_space<vmem>>, %arg3: memref<32x32xf32, #tpu.memory_space<vmem>>, %arg4: memref<1x32xf32, #tpu.memory_space<vmem>>, %arg5: memref<32x32xf32, #tpu.memory_space<vmem>>, %arg6: memref<32x1xf32, #tpu.memory_space<vmem>>, %arg7: memref<32x32xf32, #tpu.memory_space<vmem>>, %arg8: memref<1x32xf32, #tpu.memory_space<vmem>>, %arg9: memref<32x32xf32, #tpu.memory_space<vmem>>, %arg10: memref<1x32xf32, #tpu.memory_space<vmem>>, %arg11: memref<1x32xf32, #tpu.memory_space<vmem>>, %arg12: memref<1x32xf32, #tpu.memory_space<vmem>>, %arg13: memref<32x128xf32, #tpu.memory_space<vmem>>, %arg14: memref<1x128xf32, #tpu.memory_space<vmem>>, %arg15: memref<128x32xf32, #tpu.memory_space<vmem>>, %arg16: memref<1x32xf32, #tpu.memory_space<vmem>>, %arg17: memref<1x32xf32, #tpu.memory_space<vmem>>, %arg18: memref<1x32xf32, #tpu.memory_space<vmem>>, %arg19: memref<1x8x32xf32, #tpu.memory_space<vmem>>, %arg20: memref<4x8x8xf32, #tpu.memory_space<vmem>>, %arg21: memref<4x8x8xf32, #tpu.memory_space<vmem>>) attributes {dimension_semantics = [#tpu.dimension_semantics<parallel>, #tpu.dimension_semantics<arbitrary>], iteration_bounds = array<i64: 2, 1>, scalar_prefetch = 0 : i64, scratch_operands = 2 : i64, tpu.core_type = #tpu.core_type<tc>, window_params = [{transform_indices = @transform_0, window_bounds = array<i64: 1, 8, 32>}, {pipeline_mode = #tpu.pipeline_mode<synchronous>, transform_indices = @transform_1, window_bounds = array<i64: 32, 32>}, {pipeline_mode = #tpu.pipeline_mode<synchronous>, transform_indices = @transform_2, window_bounds = array<i64: 1, 32>}, {pipeline_mode = #tpu.pipeline_mode<synchronous>, transform_indices = @transform_3, window_bounds = array<i64: 32, 32>}, {pipeline_mode = #tpu.pipeline_mode<synchronous>, transform_indices = @transform_4, window_bounds = array<i64: 32, 1>}, {pipeline_mode = #tpu.pipeline_mode<synchronous>, transform_indices = @transform_5, window_bounds = array<i64: 32, 32>}, {pipeline_mode = #tpu.pipeline_mode<synchronous>, transform_indices = @transform_6, window_bounds = array<i64: 1, 32>}, {pipeline_mode = #tpu.pipeline_mode<synchronous>, transform_indices = @transform_7, window_bounds = array<i64: 32, 32>}, {pipeline_mode = #tpu.pipeline_mode<synchronous>, transform_indices = @transform_8, window_bounds = array<i64: 1, 32>}, {pipeline_mode = #tpu.pipeline_mode<synchronous>, transform_indices = @transform_9, window_bounds = array<i64: 1, 32>}, {pipeline_mode = #tpu.pipeline_mode<synchronous>, transform_indices = @transform_10, window_bounds = array<i64: 1, 32>}, {pipeline_mode = #tpu.pipeline_mode<synchronous>, transform_indices = @transform_11, window_bounds = array<i64: 32, 128>}, {pipeline_mode = #tpu.pipeline_mode<synchronous>, transform_indices = @transform_12, window_bounds = array<i64: 1, 128>}, {pipeline_mode = #tpu.pipeline_mode<synchronous>, transform_indices = @transform_13, window_bounds = array<i64: 128, 32>}, {pipeline_mode = #tpu.pipeline_mode<synchronous>, transform_indices = @transform_14, window_bounds = array<i64: 1, 32>}, {pipeline_mode = #tpu.pipeline_mode<synchronous>, transform_indices = @transform_15, window_bounds = array<i64: 1, 32>}, {pipeline_mode = #tpu.pipeline_mode<synchronous>, transform_indices = @transform_16, window_bounds = array<i64: 1, 32>}, {transform_indices = @transform_17, window_bounds = array<i64: 1, 8, 32>}]} {
    %c0_i32 = arith.constant 0 : i32
    %0 = arith.cmpi eq, %arg1, %c0_i32 : i32
    %1 = arith.extui %0 : i1 to i32
    %c0_i32_0 = arith.constant 0 : i32
    %2 = arith.cmpi ne, %1, %c0_i32_0 : i32
    scf.if %2 {
      %c0_54 = arith.constant 0 : index
      %c0_55 = arith.constant 0 : index
      %c0_56 = arith.constant 0 : index
      %117 = vector.load %arg2[%c0_54, %c0_55, %c0_56] : memref<1x8x32xf32, #tpu.memory_space<vmem>>, vector<1x8x32xf32>
      %118 = vector.shape_cast %117 : vector<1x8x32xf32> to vector<8x32xf32>
      %119 = tpu.transpose %118, [1, 0] : vector<8x32xf32> -> vector<32x8xf32>
      %c0_57 = arith.constant 0 : index
      %c0_58 = arith.constant 0 : index
      %120 = vector.load %arg5[%c0_57, %c0_58] : memref<32x32xf32, #tpu.memory_space<vmem>>, vector<32x32xf32>
      %cst_59 = arith.constant dense<0.000000e+00> : vector<32x8xf32>
      %121 = tpu.matmul %120, %119, %cst_59 {dimension_numbers = #tpu.dot_dimension_numbers<[1], [0], [0], [1], [0, 0, 1, 1], [], []>} : vector<32x32xf32>, vector<32x8xf32>, vector<32x8xf32> -> vector<32x8xf32>
      %c0_60 = arith.constant 0 : index
      %c0_61 = arith.constant 0 : index
      %122 = vector.load %arg6[%c0_60, %c0_61] : memref<32x1xf32, #tpu.memory_space<vmem>>, vector<32x1xf32>
      %123 = vector.broadcast %122 : vector<32x1xf32> to vector<32x8xf32>
      %124 = arith.addf %121, %123 : vector<32x8xf32>
      %125 = vector.shape_cast %124 : vector<32x8xf32> to vector<4x8x8xf32>
      %c0_62 = arith.constant 0 : index
      %c0_63 = arith.constant 0 : index
      %c0_64 = arith.constant 0 : index
      %126 = vector.load %arg20[%c0_62, %c0_63, %c0_64] : memref<4x8x8xf32, #tpu.memory_space<vmem>>, vector<4x8x8xf32>
      tpu.vector_store %arg20[%c0_62, %c0_63, %c0_64], %125 {strides = array<i32>} : memref<4x8x8xf32, #tpu.memory_space<vmem>>, vector<4x8x8xf32>,
      %c0_65 = arith.constant 0 : index
      %c0_66 = arith.constant 0 : index
      %127 = vector.load %arg7[%c0_65, %c0_66] : memref<32x32xf32, #tpu.memory_space<vmem>>, vector<32x32xf32>
      %cst_67 = arith.constant dense<0.000000e+00> : vector<8x32xf32>
      %128 = tpu.matmul %118, %127, %cst_67 {dimension_numbers = #tpu.dot_dimension_numbers<[1], [0], [0], [1], [0, 0, 1, 1], [], []>} : vector<8x32xf32>, vector<32x32xf32>, vector<8x32xf32> -> vector<8x32xf32>
      %c0_68 = arith.constant 0 : index
      %c0_69 = arith.constant 0 : index
      %129 = vector.load %arg8[%c0_68, %c0_69] : memref<1x32xf32, #tpu.memory_space<vmem>>, vector<1x32xf32>
      %130 = vector.broadcast %129 : vector<1x32xf32> to vector<8x32xf32>
      %131 = arith.addf %128, %130 : vector<8x32xf32>
      %132 = vector.extract_strided_slice %131 {offsets = [0, 0], sizes = [8, 8], strides = [1, 1]} : vector<8x32xf32> to vector<8x8xf32>
      %c0_70 = arith.constant 0 : index
      %c0_71 = arith.constant 0 : index
      %c0_72 = arith.constant 0 : index
      %133 = vector.load %arg21[%c0_70, %c0_71, %c0_72] : memref<4x8x8xf32, #tpu.memory_space<vmem>>, vector<1x8x8xf32>
      %134 = vector.shape_cast %133 : vector<1x8x8xf32> to vector<8x8xf32>
      %135 = vector.shape_cast %132 : vector<8x8xf32> to vector<1x8x8xf32>
      tpu.vector_store %arg21[%c0_70, %c0_71, %c0_72], %135 {strides = array<i32>} : memref<4x8x8xf32, #tpu.memory_space<vmem>>, vector<1x8x8xf32>,
      %136 = vector.extract_strided_slice %131 {offsets = [0, 8], sizes = [8, 8], strides = [1, 1]} : vector<8x32xf32> to vector<8x8xf32>
      %c1 = arith.constant 1 : index
      %c0_73 = arith.constant 0 : index
      %c0_74 = arith.constant 0 : index
      %137 = vector.load %arg21[%c1, %c0_73, %c0_74] : memref<4x8x8xf32, #tpu.memory_space<vmem>>, vector<1x8x8xf32>
      %138 = vector.shape_cast %137 : vector<1x8x8xf32> to vector<8x8xf32>
      %139 = vector.shape_cast %136 : vector<8x8xf32> to vector<1x8x8xf32>
      tpu.vector_store %arg21[%c1, %c0_73, %c0_74], %139 {strides = array<i32>} : memref<4x8x8xf32, #tpu.memory_space<vmem>>, vector<1x8x8xf32>,
      %140 = vector.extract_strided_slice %131 {offsets = [0, 16], sizes = [8, 8], strides = [1, 1]} : vector<8x32xf32> to vector<8x8xf32>
      %c2 = arith.constant 2 : index
      %c0_75 = arith.constant 0 : index
      %c0_76 = arith.constant 0 : index
      %141 = vector.load %arg21[%c2, %c0_75, %c0_76] : memref<4x8x8xf32, #tpu.memory_space<vmem>>, vector<1x8x8xf32>
      %142 = vector.shape_cast %141 : vector<1x8x8xf32> to vector<8x8xf32>
      %143 = vector.shape_cast %140 : vector<8x8xf32> to vector<1x8x8xf32>
      tpu.vector_store %arg21[%c2, %c0_75, %c0_76], %143 {strides = array<i32>} : memref<4x8x8xf32, #tpu.memory_space<vmem>>, vector<1x8x8xf32>,
      %144 = vector.extract_strided_slice %131 {offsets = [0, 24], sizes = [8, 8], strides = [1, 1]} : vector<8x32xf32> to vector<8x8xf32>
      %c3 = arith.constant 3 : index
      %c0_77 = arith.constant 0 : index
      %c0_78 = arith.constant 0 : index
      %145 = vector.load %arg21[%c3, %c0_77, %c0_78] : memref<4x8x8xf32, #tpu.memory_space<vmem>>, vector<1x8x8xf32>
      %146 = vector.shape_cast %145 : vector<1x8x8xf32> to vector<8x8xf32>
      %147 = vector.shape_cast %144 : vector<8x8xf32> to vector<1x8x8xf32>
      tpu.vector_store %arg21[%c3, %c0_77, %c0_78], %147 {strides = array<i32>} : memref<4x8x8xf32, #tpu.memory_space<vmem>>, vector<1x8x8xf32>,
    } else {
    }
    %c8_i32 = arith.constant 8 : i32
    %3 = arith.muli %arg1, %c8_i32 : i32
    %4 = tpu.assume_multiple %3, 8 : i32
    %c0 = arith.constant 0 : index
    %5 = arith.index_cast %4 : i32 to index
    %c0_1 = arith.constant 0 : index
    %6 = vector.load %arg2[%c0, %5, %c0_1] : memref<1x8x32xf32, #tpu.memory_space<vmem>>, vector<1x8x32xf32>
    %7 = vector.shape_cast %6 : vector<1x8x32xf32> to vector<8x32xf32>
    %c0_2 = arith.constant 0 : index
    %c0_3 = arith.constant 0 : index
    %8 = vector.load %arg3[%c0_2, %c0_3] : memref<32x32xf32, #tpu.memory_space<vmem>>, vector<32x32xf32>
    %cst = arith.constant dense<0.000000e+00> : vector<8x32xf32>
    %9 = tpu.matmul %7, %8, %cst {dimension_numbers = #tpu.dot_dimension_numbers<[1], [0], [0], [1], [0, 0, 1, 1], [], []>} : vector<8x32xf32>, vector<32x32xf32>, vector<8x32xf32> -> vector<8x32xf32>
    %c0_4 = arith.constant 0 : index
    %c0_5 = arith.constant 0 : index
    %10 = vector.load %arg4[%c0_4, %c0_5] : memref<1x32xf32, #tpu.memory_space<vmem>>, vector<1x32xf32>
    %11 = vector.broadcast %10 : vector<1x32xf32> to vector<8x32xf32>
    %12 = arith.addf %9, %11 : vector<8x32xf32>
    %cst_6 = arith.constant 0.353553385 : f32
    %13 = vector.broadcast %cst_6 : f32 to vector<8x32xf32>
    %14 = arith.mulf %12, %13 : vector<8x32xf32>
    %15 = vector.extract_strided_slice %14 {offsets = [0, 0], sizes = [8, 8], strides = [1, 1]} : vector<8x32xf32> to vector<8x8xf32>
    %16 = vector.extract_strided_slice %14 {offsets = [0, 8], sizes = [8, 8], strides = [1, 1]} : vector<8x32xf32> to vector<8x8xf32>
    %17 = vector.extract_strided_slice %14 {offsets = [0, 16], sizes = [8, 8], strides = [1, 1]} : vector<8x32xf32> to vector<8x8xf32>
    %18 = vector.extract_strided_slice %14 {offsets = [0, 24], sizes = [8, 8], strides = [1, 1]} : vector<8x32xf32> to vector<8x8xf32>
    %19 = vector.shape_cast %15 : vector<8x8xf32> to vector<1x8x8xf32>
    %20 = vector.shape_cast %16 : vector<8x8xf32> to vector<1x8x8xf32>
    %21 = vector.shape_cast %17 : vector<8x8xf32> to vector<1x8x8xf32>
    %22 = vector.shape_cast %18 : vector<8x8xf32> to vector<1x8x8xf32>
    %23 = tpu.concatenate %19, %20, %21, %22 in 0 : vector<1x8x8xf32>, vector<1x8x8xf32>, vector<1x8x8xf32>, vector<1x8x8xf32> -> vector<4x8x8xf32>
    %c0_7 = arith.constant 0 : index
    %c0_8 = arith.constant 0 : index
    %c0_9 = arith.constant 0 : index
    %24 = vector.load %arg20[%c0_7, %c0_8, %c0_9] : memref<4x8x8xf32, #tpu.memory_space<vmem>>, vector<4x8x8xf32>
    "tpu.trace_start"() <{level = 10 : i32, message = "hqd,hdk->hqk"}> : () -> ()
    %cst_10 = arith.constant dense<0.000000e+00> : vector<4x8x8xf32>
    %25 = tpu.matmul %23, %24, %cst_10 {dimension_numbers = #tpu.dot_dimension_numbers<[2], [1], [1], [2], [0, 0, 0, 1, 1, 2], [0], [0]>} : vector<4x8x8xf32>, vector<4x8x8xf32>, vector<4x8x8xf32> -> vector<4x8x8xf32>
    "tpu.trace_stop"() : () -> ()
    %cst_11 = arith.constant dense<0xFF800000> : vector<4x8xf32>
    %26 = vector.multi_reduction <maximumf>, %25, %cst_11 [2] : vector<4x8x8xf32> to vector<4x8xf32>
    %27 = vector.shape_cast %26 : vector<4x8xf32> to vector<4x8x1xf32>
    %28 = vector.broadcast %27 : vector<4x8x1xf32> to vector<4x8x8xf32>
    %29 = arith.subf %25, %28 : vector<4x8x8xf32>
    %30 = math.exp %29 : vector<4x8x8xf32>
    %cst_12 = arith.constant dense<0.000000e+00> : vector<4x8xf32>
    %31 = vector.multi_reduction <add>, %30, %cst_12 [2] : vector<4x8x8xf32> to vector<4x8xf32>
    %32 = vector.shape_cast %31 : vector<4x8xf32> to vector<4x8x1xf32>
    %c0_13 = arith.constant 0 : index
    %c0_14 = arith.constant 0 : index
    %c0_15 = arith.constant 0 : index
    %33 = vector.load %arg21[%c0_13, %c0_14, %c0_15] : memref<4x8x8xf32, #tpu.memory_space<vmem>>, vector<4x8x8xf32>
    "tpu.trace_start"() <{level = 10 : i32, message = "hqk,hkd->hqd"}> : () -> ()
    %cst_16 = arith.constant dense<0.000000e+00> : vector<4x8x8xf32>
    %34 = tpu.matmul %30, %33, %cst_16 {dimension_numbers = #tpu.dot_dimension_numbers<[2], [1], [1], [2], [0, 0, 0, 1, 1, 2], [0], [0]>} : vector<4x8x8xf32>, vector<4x8x8xf32>, vector<4x8x8xf32> -> vector<4x8x8xf32>
    "tpu.trace_stop"() : () -> ()
    %35 = tpu.reciprocal %32 : vector<4x8x1xf32> -> vector<4x8x1xf32>
    %36 = vector.broadcast %35 : vector<4x8x1xf32> to vector<4x8x8xf32>
    %37 = arith.mulf %34, %36 : vector<4x8x8xf32>
    %38 = vector.extract_strided_slice %37 {offsets = [0, 0, 0], sizes = [1, 8, 8], strides = [1, 1, 1]} : vector<4x8x8xf32> to vector<1x8x8xf32>
    %39 = vector.shape_cast %38 : vector<1x8x8xf32> to vector<8x8xf32>
    %40 = vector.extract_strided_slice %37 {offsets = [1, 0, 0], sizes = [1, 8, 8], strides = [1, 1, 1]} : vector<4x8x8xf32> to vector<1x8x8xf32>
    %41 = vector.shape_cast %40 : vector<1x8x8xf32> to vector<8x8xf32>
    %42 = vector.extract_strided_slice %37 {offsets = [2, 0, 0], sizes = [1, 8, 8], strides = [1, 1, 1]} : vector<4x8x8xf32> to vector<1x8x8xf32>
    %43 = vector.shape_cast %42 : vector<1x8x8xf32> to vector<8x8xf32>
    %44 = vector.extract_strided_slice %37 {offsets = [3, 0, 0], sizes = [1, 8, 8], strides = [1, 1, 1]} : vector<4x8x8xf32> to vector<1x8x8xf32>
    %45 = vector.shape_cast %44 : vector<1x8x8xf32> to vector<8x8xf32>
    %46 = tpu.concatenate %39, %41, %43, %45 in 1 : vector<8x8xf32>, vector<8x8xf32>, vector<8x8xf32>, vector<8x8xf32> -> vector<8x32xf32>
    %c0_17 = arith.constant 0 : index
    %c0_18 = arith.constant 0 : index
    %47 = vector.load %arg9[%c0_17, %c0_18] : memref<32x32xf32, #tpu.memory_space<vmem>>, vector<32x32xf32>
    %cst_19 = arith.constant dense<0.000000e+00> : vector<8x32xf32>
    %48 = tpu.matmul %46, %47, %cst_19 {dimension_numbers = #tpu.dot_dimension_numbers<[1], [0], [0], [1], [0, 0, 1, 1], [], []>} : vector<8x32xf32>, vector<32x32xf32>, vector<8x32xf32> -> vector<8x32xf32>
    %c0_20 = arith.constant 0 : index
    %c0_21 = arith.constant 0 : index
    %49 = vector.load %arg10[%c0_20, %c0_21] : memref<1x32xf32, #tpu.memory_space<vmem>>, vector<1x32xf32>
    %50 = vector.broadcast %49 : vector<1x32xf32> to vector<8x32xf32>
    %51 = arith.addf %48, %50 : vector<8x32xf32>
    %52 = arith.addf %51, %7 : vector<8x32xf32>
    %c0_22 = arith.constant 0 : index
    %c0_23 = arith.constant 0 : index
    %53 = vector.load %arg11[%c0_22, %c0_23] : memref<1x32xf32, #tpu.memory_space<vmem>>, vector<1x32xf32>
    %c0_24 = arith.constant 0 : index
    %c0_25 = arith.constant 0 : index
    %54 = vector.load %arg12[%c0_24, %c0_25] : memref<1x32xf32, #tpu.memory_space<vmem>>, vector<1x32xf32>
    %cst_26 = arith.constant dense<0.000000e+00> : vector<8xf32>
    %55 = vector.multi_reduction <add>, %52, %cst_26 [1] : vector<8x32xf32> to vector<8xf32>
    %56 = vector.shape_cast %55 : vector<8xf32> to vector<8x1xf32>
    %cst_27 = arith.constant 3.200000e+01 : f32
    %57 = vector.broadcast %cst_27 : f32 to vector<8x1xf32>
    %58 = arith.divf %56, %57 : vector<8x1xf32>
    %59 = vector.broadcast %58 : vector<8x1xf32> to vector<8x32xf32>
    %60 = arith.subf %52, %59 : vector<8x32xf32>
    %61 = arith.mulf %60, %60 : vector<8x32xf32>
    %cst_28 = arith.constant dense<0.000000e+00> : vector<8xf32>
    %62 = vector.multi_reduction <add>, %61, %cst_28 [1] : vector<8x32xf32> to vector<8xf32>
    %63 = vector.shape_cast %62 : vector<8xf32> to vector<8x1xf32>
    %cst_29 = arith.constant 3.200000e+01 : f32
    %64 = vector.broadcast %cst_29 : f32 to vector<8x1xf32>
    %65 = arith.divf %63, %64 : vector<8x1xf32>
    %66 = vector.broadcast %58 : vector<8x1xf32> to vector<8x32xf32>
    %67 = arith.subf %52, %66 : vector<8x32xf32>
    %cst_30 = arith.constant 9.99999974E-6 : f32
    %68 = vector.broadcast %cst_30 : f32 to vector<8x1xf32>
    %69 = arith.addf %65, %68 : vector<8x1xf32>
    %70 = math.rsqrt %69 : vector<8x1xf32>
    %71 = vector.broadcast %70 : vector<8x1xf32> to vector<8x32xf32>
    %72 = arith.mulf %67, %71 : vector<8x32xf32>
    %73 = vector.broadcast %53 : vector<1x32xf32> to vector<8x32xf32>
    %74 = arith.mulf %72, %73 : vector<8x32xf32>
    %75 = vector.broadcast %54 : vector<1x32xf32> to vector<8x32xf32>
    %76 = arith.addf %74, %75 : vector<8x32xf32>
    %c0_31 = arith.constant 0 : index
    %c0_32 = arith.constant 0 : index
    %77 = vector.load %arg13[%c0_31, %c0_32] : memref<32x128xf32, #tpu.memory_space<vmem>>, vector<32x128xf32>
    %cst_33 = arith.constant dense<0.000000e+00> : vector<8x128xf32>
    %78 = tpu.matmul %76, %77, %cst_33 {dimension_numbers = #tpu.dot_dimension_numbers<[1], [0], [0], [1], [0, 0, 1, 1], [], []>} : vector<8x32xf32>, vector<32x128xf32>, vector<8x128xf32> -> vector<8x128xf32>
    %c0_34 = arith.constant 0 : index
    %c0_35 = arith.constant 0 : index
    %79 = vector.load %arg14[%c0_34, %c0_35] : memref<1x128xf32, #tpu.memory_space<vmem>>, vector<1x128xf32>
    %80 = vector.broadcast %79 : vector<1x128xf32> to vector<8x128xf32>
    %81 = arith.addf %78, %80 : vector<8x128xf32>
    %cst_36 = arith.constant 0.000000e+00 : f32
    %82 = vector.broadcast %cst_36 : f32 to vector<8x128xf32>
    %83 = arith.maximumf %81, %82 : vector<8x128xf32>
    %c0_37 = arith.constant 0 : index
    %c0_38 = arith.constant 0 : index
    %84 = vector.load %arg15[%c0_37, %c0_38] : memref<128x32xf32, #tpu.memory_space<vmem>>, vector<128x32xf32>
    %cst_39 = arith.constant dense<0.000000e+00> : vector<8x32xf32>
    %85 = tpu.matmul %83, %84, %cst_39 {dimension_numbers = #tpu.dot_dimension_numbers<[1], [0], [0], [1], [0, 0, 1, 1], [], []>} : vector<8x128xf32>, vector<128x32xf32>, vector<8x32xf32> -> vector<8x32xf32>
    %c0_40 = arith.constant 0 : index
    %c0_41 = arith.constant 0 : index
    %86 = vector.load %arg16[%c0_40, %c0_41] : memref<1x32xf32, #tpu.memory_space<vmem>>, vector<1x32xf32>
    %87 = vector.broadcast %86 : vector<1x32xf32> to vector<8x32xf32>
    %88 = arith.addf %85, %87 : vector<8x32xf32>
    %89 = arith.addf %88, %76 : vector<8x32xf32>
    %c0_42 = arith.constant 0 : index
    %c0_43 = arith.constant 0 : index
    %90 = vector.load %arg17[%c0_42, %c0_43] : memref<1x32xf32, #tpu.memory_space<vmem>>, vector<1x32xf32>
    %c0_44 = arith.constant 0 : index
    %c0_45 = arith.constant 0 : index
    %91 = vector.load %arg18[%c0_44, %c0_45] : memref<1x32xf32, #tpu.memory_space<vmem>>, vector<1x32xf32>
    %cst_46 = arith.constant dense<0.000000e+00> : vector<8xf32>
    %92 = vector.multi_reduction <add>, %89, %cst_46 [1] : vector<8x32xf32> to vector<8xf32>
    %93 = vector.shape_cast %92 : vector<8xf32> to vector<8x1xf32>
    %cst_47 = arith.constant 3.200000e+01 : f32
    %94 = vector.broadcast %cst_47 : f32 to vector<8x1xf32>
    %95 = arith.divf %93, %94 : vector<8x1xf32>
    %96 = vector.broadcast %95 : vector<8x1xf32> to vector<8x32xf32>
    %97 = arith.subf %89, %96 : vector<8x32xf32>
    %98 = arith.mulf %97, %97 : vector<8x32xf32>
    %cst_48 = arith.constant dense<0.000000e+00> : vector<8xf32>
    %99 = vector.multi_reduction <add>, %98, %cst_48 [1] : vector<8x32xf32> to vector<8xf32>
    %100 = vector.shape_cast %99 : vector<8xf32> to vector<8x1xf32>
    %cst_49 = arith.constant 3.200000e+01 : f32
    %101 = vector.broadcast %cst_49 : f32 to vector<8x1xf32>
    %102 = arith.divf %100, %101 : vector<8x1xf32>
    %103 = vector.broadcast %95 : vector<8x1xf32> to vector<8x32xf32>
    %104 = arith.subf %89, %103 : vector<8x32xf32>
    %cst_50 = arith.constant 9.99999974E-6 : f32
    %105 = vector.broadcast %cst_50 : f32 to vector<8x1xf32>
    %106 = arith.addf %102, %105 : vector<8x1xf32>
    %107 = math.rsqrt %106 : vector<8x1xf32>
    %108 = vector.broadcast %107 : vector<8x1xf32> to vector<8x32xf32>
    %109 = arith.mulf %104, %108 : vector<8x32xf32>
    %110 = vector.broadcast %90 : vector<1x32xf32> to vector<8x32xf32>
    %111 = arith.mulf %109, %110 : vector<8x32xf32>
    %112 = vector.broadcast %91 : vector<1x32xf32> to vector<8x32xf32>
    %113 = arith.addf %111, %112 : vector<8x32xf32>
    %c0_51 = arith.constant 0 : index
    %c0_52 = arith.constant 0 : index
    %c0_53 = arith.constant 0 : index
    %114 = vector.load %arg19[%c0_51, %c0_52, %c0_53] : memref<1x8x32xf32, #tpu.memory_space<vmem>>, vector<1x8x32xf32>
    %115 = vector.shape_cast %114 : vector<1x8x32xf32> to vector<8x32xf32>
    %116 = vector.shape_cast %113 : vector<8x32xf32> to vector<1x8x32xf32>
    tpu.vector_store %arg19[%c0_51, %c0_52, %c0_53], %116 {strides = array<i32>} : memref<1x8x32xf32, #tpu.memory_space<vmem>>, vector<1x8x32xf32>,
    return
  }
  func.func @transform_0(%arg0: i32, %arg1: i32) -> (i32, i32, i32) {
    %c0_i32 = arith.constant 0 : i32
    %c0_i32_0 = arith.constant 0 : i32
    %c0_i32_1 = arith.constant 0 : i32
    return %arg0, %c0_i32, %c0_i32_0 : i32, i32, i32
  }
  func.func @transform_1(%arg0: i32, %arg1: i32) -> (i32, i32) {
    %c0_i32 = arith.constant 0 : i32
    %c0_i32_0 = arith.constant 0 : i32
    %c0_i32_1 = arith.constant 0 : i32
    return %c0_i32, %c0_i32_0 : i32, i32
  }
  func.func @transform_2(%arg0: i32, %arg1: i32) -> (i32, i32) {
    %c0_i32 = arith.constant 0 : i32
    %c0_i32_0 = arith.constant 0 : i32
    %c0_i32_1 = arith.constant 0 : i32
    return %c0_i32, %c0_i32_0 : i32, i32
  }
  func.func @transform_3(%arg0: i32, %arg1: i32) -> (i32, i32) {
    %c0_i32 = arith.constant 0 : i32
    %c0_i32_0 = arith.constant 0 : i32
    %c0_i32_1 = arith.constant 0 : i32
    return %c0_i32, %c0_i32_0 : i32, i32
  }
  func.func @transform_4(%arg0: i32, %arg1: i32) -> (i32, i32) {
    %c0_i32 = arith.constant 0 : i32
    %c0_i32_0 = arith.constant 0 : i32
    %c0_i32_1 = arith.constant 0 : i32
    return %c0_i32, %c0_i32_0 : i32, i32
  }
  func.func @transform_5(%arg0: i32, %arg1: i32) -> (i32, i32) {
    %c0_i32 = arith.constant 0 : i32
    %c0_i32_0 = arith.constant 0 : i32
    %c0_i32_1 = arith.constant 0 : i32
    return %c0_i32, %c0_i32_0 : i32, i32
  }
  func.func @transform_6(%arg0: i32, %arg1: i32) -> (i32, i32) {
    %c0_i32 = arith.constant 0 : i32
    %c0_i32_0 = arith.constant 0 : i32
    %c0_i32_1 = arith.constant 0 : i32
    return %c0_i32, %c0_i32_0 : i32, i32
  }
  func.func @transform_7(%arg0: i32, %arg1: i32) -> (i32, i32) {
    %c0_i32 = arith.constant 0 : i32
    %c0_i32_0 = arith.constant 0 : i32
    %c0_i32_1 = arith.constant 0 : i32
    return %c0_i32, %c0_i32_0 : i32, i32
  }
  func.func @transform_8(%arg0: i32, %arg1: i32) -> (i32, i32) {
    %c0_i32 = arith.constant 0 : i32
    %c0_i32_0 = arith.constant 0 : i32
    %c0_i32_1 = arith.constant 0 : i32
    return %c0_i32, %c0_i32_0 : i32, i32
  }
  func.func @transform_9(%arg0: i32, %arg1: i32) -> (i32, i32) {
    %c0_i32 = arith.constant 0 : i32
    %c0_i32_0 = arith.constant 0 : i32
    %c0_i32_1 = arith.constant 0 : i32
    return %c0_i32, %c0_i32_0 : i32, i32
  }
  func.func @transform_10(%arg0: i32, %arg1: i32) -> (i32, i32) {
    %c0_i32 = arith.constant 0 : i32
    %c0_i32_0 = arith.constant 0 : i32
    %c0_i32_1 = arith.constant 0 : i32
    return %c0_i32, %c0_i32_0 : i32, i32
  }
  func.func @transform_11(%arg0: i32, %arg1: i32) -> (i32, i32) {
    %c0_i32 = arith.constant 0 : i32
    %c0_i32_0 = arith.constant 0 : i32
    %c0_i32_1 = arith.constant 0 : i32
    return %c0_i32, %c0_i32_0 : i32, i32
  }
  func.func @transform_12(%arg0: i32, %arg1: i32) -> (i32, i32) {
    %c0_i32 = arith.constant 0 : i32
    %c0_i32_0 = arith.constant 0 : i32
    %c0_i32_1 = arith.constant 0 : i32
    return %c0_i32, %c0_i32_0 : i32, i32
  }
  func.func @transform_13(%arg0: i32, %arg1: i32) -> (i32, i32) {
    %c0_i32 = arith.constant 0 : i32
    %c0_i32_0 = arith.constant 0 : i32
    %c0_i32_1 = arith.constant 0 : i32
    return %c0_i32, %c0_i32_0 : i32, i32
  }
  func.func @transform_14(%arg0: i32, %arg1: i32) -> (i32, i32) {
    %c0_i32 = arith.constant 0 : i32
    %c0_i32_0 = arith.constant 0 : i32
    %c0_i32_1 = arith.constant 0 : i32
    return %c0_i32, %c0_i32_0 : i32, i32
  }
  func.func @transform_15(%arg0: i32, %arg1: i32) -> (i32, i32) {
    %c0_i32 = arith.constant 0 : i32
    %c0_i32_0 = arith.constant 0 : i32
    %c0_i32_1 = arith.constant 0 : i32
    return %c0_i32, %c0_i32_0 : i32, i32
  }
  func.func @transform_16(%arg0: i32, %arg1: i32) -> (i32, i32) {
    %c0_i32 = arith.constant 0 : i32
    %c0_i32_0 = arith.constant 0 : i32
    %c0_i32_1 = arith.constant 0 : i32
    return %c0_i32, %c0_i32_0 : i32, i32
  }
  func.func @transform_17(%arg0: i32, %arg1: i32) -> (i32, i32, i32) {
    %c0_i32 = arith.constant 0 : i32
    %c0_i32_0 = arith.constant 0 : i32
    return %arg0, %arg1, %c0_i32 : i32, i32, i32
  }
}

</mosaic_0001>

<bundles_post_ra>
// kernel: tpu_custom_call.1
= control target key start
LH: loop header
LB: loop body
LE: loop exit
PB: predicated region body
PF: predicated region fallthrough
CT: control target
= control target key end

     0   :  { %s2848_s0 = inlined_call_operand.vmem [shape: f32[2,8,32], index: 0, kind: input, shape index: {}]   ;;  %s2849_s1 = inlined_call_operand.vmem [shape: f32[32,32], index: 1, kind: input, shape index: {}]   ;;  %s2850_s2 = inlined_call_operand.vmem [shape: f32[1,32], index: 2, kind: input, shape index: {}]   ;;  %s2851_s3 = inlined_call_operand.vmem [shape: f32[32,32], index: 3, kind: input, shape index: {}]   ;;  %s2852_s4 = inlined_call_operand.vmem [shape: f32[32,1], index: 4, kind: input, shape index: {}]   ;;  %s2853_s5 = inlined_call_operand.vmem [shape: f32[32,32], index: 5, kind: input, shape index: {}]   ;;  %s2854_s6 = inlined_call_operand.vmem [shape: f32[1,32], index: 6, kind: input, shape index: {}]   ;;  %s2855_s7 = inlined_call_operand.vmem [shape: f32[32,32], index: 7, kind: input, shape index: {}]   ;;  %s2856_s8 = inlined_call_operand.vmem [shape: f32[1,32], index: 8, kind: input, shape index: {}]   ;;  %s2857_s9 = inlined_call_operand.vmem [shape: f32[1,32], index: 9, kind: input, shape index: {}]   ;;  %s2858_s10 = inlined_call_operand.vmem [shape: f32[1,32], index: 10, kind: input, shape index: {}]   ;;  %s2859_s11 = inlined_call_operand.vmem [shape: f32[32,128], index: 11, kind: input, shape index: {}]   ;;  %s2860_s12 = inlined_call_operand.vmem [shape: f32[1,128], index: 12, kind: input, shape index: {}]   ;;  %s2861_s13 = inlined_call_operand.vmem [shape: f32[128,32], index: 13, kind: input, shape index: {}]   ;;  %s2862_s14 = inlined_call_operand.vmem [shape: f32[1,32], index: 14, kind: input, shape index: {}]   ;;  %s2863_s15 = inlined_call_operand.vmem [shape: f32[1,32], index: 15, kind: input, shape index: {}]   ;;  %s2864_s16 = inlined_call_operand.vmem [shape: f32[1,32], index: 16, kind: input, shape index: {}]   ;;  %s2865_s17 = inlined_call_operand.hbm [shape: f32[2,8,32], index: 17, kind: output, shape index: {}]  }
   0x1   :  { %2875 = sst [smem:[#allocation14_spill]] %s2848_s0 }
   0x2   :  { %2876 = sst [smem:[#allocation15_spill]] %s2849_s1 }
   0x3   :  { %2877 = sst [smem:[#allocation16_spill]] %s2850_s2 }
   0x4   :  { %2878 = sst [smem:[#allocation17_spill]] %s2864_s16 }
   0x5   :  { %2879 = sst [smem:[#allocation18_spill]] %s2865_s17 }
   0x6   :  { %22 = vsyncpa [#allocation5], 0 }
   0x7   :  { %24 = vsyncpa [#allocation5 + $0x1], 0  ;;  %s2488_s24 = smov 0   ;;  %s2490_s25 = smov 0  }
   0x8   :  { %s2492_s26 = smov 0   ;;  %s2494_s27 = smov 0  }
   0x9   :  { %s2496_s28 = smov 0   ;;  %s2498_s29 = smov 0  }
   0xa LB: > { %2880 = sst [smem:[#allocation7_spill]] %s2365_s24  ;;  %s1950_s0 = sadd.s32 4294967295, %s2385_s29   ;;  %s2385_s29 = sphi %s2498_s29, %s30_s29   ;;  %s2381_s28 = sphi %s2496_s28, %s2901_s28   ;;  %s2377_s27 = sphi %s2494_s27, %s2900_s27   ;;  %s2373_s26 = sphi %s2492_s26, %s2899_s26   ;;  %s2369_s25 = sphi %s2490_s25, %s2903_s25   ;;  %s2365_s24 = sphi %s2488_s24, %s2902_s24  }
   0xb   : > { %2881 = sst [smem:[#allocation8_spill]] %s2373_s26  ;;  %s1951_s30 = sadd.s32 4294967294, %s2385_s29  }
   0xc   : > { %2882 = sst [smem:[#allocation9_spill]] %s2381_s28  ;;  %s42_s18 = sadd.s32 1, %s2381_s28 }
   0xd   : > { %2883 = sst [smem:[#allocation10_spill]] %s2385_s29  ;;  %s413_s19 = sadd.s32 1, %s2373_s26 }
   0xe   : > { %p44_p0 = scmp.ge.s32.totalorder %s42_s18, 2  ;;  %p423_p1 = scmp.ne.s32.totalorder %s2373_s26, %s2369_s25 }
   0xf   : > { %p424_p2 = scmp.eq.s32.totalorder %s1950_s0, 1  ;;  %p429_p3 = scmp.ne.s32.totalorder %s2369_s25, %s2365_s24 }
  0x10   : > { %s2905_s18 = smov (%p44_p0, %s42_s18), 0  ;;  %p430_p5 = scmp.eq.s32.totalorder %s1951_s30, 1 }
  0x11   : > { %2884 = sst [smem:[#allocation11_spill]] %s2905_s18  ;;  %p2528_p4 = por %p424_p2, %p423_p1 }
  0x12   : > { %s408_s20 = ssub.s32 %s2381_s28, %s2905_s18  ;;  %p1954_p6 = scmp.ge.s32.totalorder %s2385_s29, 1 }
  0x13   : > { %p411_p7 = scmp.eq.s32.totalorder %s408_s20, 0  ;;  %p2535_p8 = por %p430_p5, %p429_p3 }
  0x14   : > { %p503_p9 = scmp.lt.s32.totalorder %s2385_s29, 3 }
  0x15   : > { %s2886_s21 = scalar_select %p2535_p8, 1, 0 }
  0x16   : > { %s2541_s22 = scalar_select %p411_p7, %s2373_s26, %s413_s19  }
  0x17   : > { %2887 = sst [smem:[#allocation12_spill]] %s2886_s21  ;;  %p504_p10 = pnand %p1954_p6, %p503_p9 }
  0x18   : > { %2888 = sst [smem:[#allocation13_spill]] %s2541_s22  ;;  %p554_p11 = scmp.lt.s32.totalorder (!%p504_p10), %s2377_s27, 1  ;;  %vm591_vm0 = vcmask (!%p504_p10), 261120   ;;  %v563_v0 = vld [vmem:[%s2851_s3] sm:$0xff] (!%p504_p10)  ;;  %v2387_v1 = vmov (!%p504_p10), 0   ;;  %v2388_v2 = vmov (!%p504_p10), 0.0  }
  0x19   : > { %507 = sbr.rel (%p504_p10) target bundleno = 2382 (0x94e), region = 88  ;;  %2047 = vmatprep.mubr.msk.f32.mxu0 (!%p504_p10), %vm591_vm0, %v563_v0  ;;  %2285 = vset.pattern.permute.xlu0 (!%p504_p10), %v2387_v1  ;;  %vm2389_vm1 = vmmov (!%p504_p10), 0   ;;  %v567_v3 = vld [vmem:[%s2852_s4] sm:$0xff] (!%p504_p10)  ;;  %v569_v4 = vld [vmem:[%s2852_s4 + $0x10] sm:$0xff] (!%p504_p10)  ;;  %s2889_s26 = sld [smem:[#allocation14_spill]] (!%p504_p10)  ;;  %v698_v6 = vld [vmem:[%s2853_s5 + $0x8] sm:$0xff] (!%p504_p10) }
  0x1a   : > { %2286 = vset.pattern.permute.xlu1 (!%p504_p10), %v2387_v1  ;;  %2085 = vmatprep.subr.mxu1 (!%p504_p10), %v2388_v2  ;;  %v697_v5 = vld [vmem:[%s2853_s5] sm:$0xff] (!%p504_p10)  ;;  %v568_v8 = vld [vmem:[%s2852_s4 + $0x8] sm:$0xff] (!%p504_p10)  ;;  %v570_v9 = vld [vmem:[%s2852_s4 + $0x18] sm:$0xff] (!%p504_p10)  ;;  %v2390_v12 = vmov (!%p504_p10), 0.0|0.0   ;;  %vm692_vm2 = vcmask (!%p504_p10), 64512   ;;  %s2892_s2 = sld [smem:[#allocation16_spill]] (!%p504_p10) }
  0x1b   : > { %2087 = vmatprep.mubr.msk.f32.mxu1 (!%p504_p10), %vm2389_vm1, %v2388_v2  ;;  %573 = vperm.xlu0 (!%p504_p10), %2285, %v567_v3   ;;  %v564_v10 = vld [vmem:[%s2851_s3 + $0x8] sm:$0xff] (!%p504_p10)  ;;  %v2173_v11 = vpack.c.bf16 (!%p504_p10), %v698_v6, %v697_v5  ;;  %v565_v13 = vld [vmem:[%s2851_s3 + $0x10] sm:$0xff] (!%p504_p10)  ;;  %v700_v15 = vld [vmem:[%s2853_s5 + $0x18] sm:$0xff] (!%p504_p10)  ;;  %s2391_s18 = smov (!%p504_p10), 112   ;;  %s2394_s23 = smov (!%p504_p10), 8   ;;  %vm1537_vm3 = vcmask (!%p504_p10), 130048  }
  0x1c   : > { %583 = vperm.xlu1 (!%p504_p10), %2286, %v569_v4   ;;  %v699_v14 = vld [vmem:[%s2853_s5 + $0x10] sm:$0xff] (!%p504_p10)  ;;  %v566_v16 = vld [vmem:[%s2851_s3 + $0x18] sm:$0xff] (!%p504_p10)  ;;  %v1962_v36 = vld [vmem:[%s2854_s6] ss:$0 sm:$0xff] (!%p504_p10)  ;;  %s2395_s0 = smov (!%p504_p10), 16   ;;  %vm1539_vm4 = vcmask (!%p504_p10), 195584  }
  0x1d   : > { %v2176_v17 = vpack.c.bf16 (!%p504_p10), %v700_v15, %v699_v14  ;;  %s2893_s24 = sld [smem:[#allocation17_spill]] (!%p504_p10)  ;;  %s1984_s29 = sshll.u32 (!%p504_p10), %s2377_s27, 7 }
  0x1f   : > { %578 = vperm.xlu0 (!%p504_p10), %2285, %v568_v8  }
  0x20   : > { %s555_s30 = scalar_select %p554_p11, %s2377_s27, 1  ;;  %588 = vperm.xlu1 %2286, %v570_v9   ;;  %v1964_v41 = vld [vmem:[%s2892_s2] ss:$0 sm:$0xff] }
  0x21   : > { %s2397_s27 = smov [#allocation4]  }
  0x22   : > { %s1956_s19 = sshll.u32 %s555_s30, 3  ;;  %s2392_s30 = smov 120  }
  0x23   : > { %s557_s21 = scalar_lea.vmem %s2889_s26, %s1956_s19  ;;  %s2890_s26 = sld [smem:[#allocation15_spill]] }
  0x24   : > { %v2567_v7 = vld [vmem:[%s557_s21] sm:$0xff] }
  0x25   : > { %2045 = vmatprep.subr.msk.mxu0 %vm591_vm0, %v2567_v7 }
  0x26   : > { %2046 = vmatpush3.xpose.msk.msra.mxu0 %vm591_vm0, %v2567_v7 }
  0x27   : > { %2172 = vmatprep.subr.bf16.mxu0 %v2390_v12 }
  0x29   : > { %2048 = vmatmul.mubr.msk.f32.vlgmr.msra.gmra.mrb[0].mxu0 %vm591_vm0, %v564_v10  ;;  %s2891_s16 = smov %s2890_s26  ;;  %v798_v18 = vld [vmem:[%s2890_s26] sm:$0xff]  ;;  %s2393_s26 = smov 104  }
  0x2a   : > { %2174 = vmatpush3.bf16.msra.mxu0 %v2173_v11  ;;  %2050 = vmatprep.mubr.msk.f32.mxu0 %vm591_vm0, %v565_v13  ;;  %v799_v19 = vld [vmem:[%s2891_s16 + $0x8] sm:$0xff]  ;;  %v800_v21 = vld [vmem:[%s2891_s16 + $0x10] sm:$0xff]  ;;  %v801_v22 = vld [vmem:[%s2891_s16 + $0x18] sm:$0xff] }
  0x2b   : > { %2175 = vmatprep.subr.bf16.mxu0 %v2390_v12  ;;  %v2179_v20 = vpack.c.bf16 %v799_v19, %v798_v18  ;;  %v2182_v23 = vpack.c.bf16 %v801_v22, %v800_v21 }
  0x2d   : > { %2051 = vmatmul.mubr.msk.f32.gmra.mrb[2].mxu0 %vm591_vm0, %v566_v16 }
  0x2e   : > { %2177 = vmatpush3.bf16.msra.mxu0 %v2176_v17  ;;  %2061 = vmatprep.mubr.msk.f32.mxu0 %vm2389_vm1, %v2388_v2 }
  0x2f   : > { %2178 = vmatprep.subr.bf16.mxu0 %v2390_v12 }
  0x31   : > { %2062 = vmatmul.mubr.msk.f32.vlgmr.msra.gmra.mrb[4].mxu0 %vm591_vm0, %v2567_v7 }
  0x32   : > { %2180 = vmatpush3.bf16.msra.mxu0 %v2179_v20  ;;  %2072 = vmatprep.mubr.msk.f32.mxu0 %vm2389_vm1, %v2388_v2 }
  0x33   : > { %2181 = vmatprep.subr.bf16.mxu0 %v2390_v12 }
  0x36   : > { %2183 = vmatpush3.bf16.msra.mxu0 %v2182_v23 }
  0x37   : > { %2075 = vmatprep.subr.mxu0 %v2388_v2 }
  0x39   : > { %2073 = vmatmul.mubr.msk.f32.vlgmr.msra.gmra.mrb[6].mxu0 %vm591_vm0, %v2567_v7 }
  0x3a   : > { %2077 = vmatprep.mubr.msk.f32.mxu0 %vm2389_vm1, %v2388_v2 }
  0x9a   : > { %v574_v24 = vpop.permute.xlu0 %573 }
  0x9b   : > { %v584_v25 = vpop.permute.xlu1 %583 }
  0x9e   : > { %v579_v26 = vpop.permute.xlu0 %578 }
  0x9f   : > { %v589_v31 = vpop.permute.xlu1 %588 }
  0xfc   : > { %v2049_v27 = vpop.f32.mrb[0].mxu0 }
  0xfd   : > { %v679_v28 = vadd.f32 %v2049_v27, %v579_v26  ;;  %v673_v29 = vpop.f32.mrb[1].mxu0 }
  0xfe   : > { %v674_v30 = vadd.f32 %v673_v29, %v574_v24 }
  0xff   : > { %694 = vst.msk [vmem:[#allocation2 + $0x8] sm:$0xff] %vm692_vm2, %v679_v28 }
 0x100   : > { %693 = vst.msk [vmem:[#allocation2] sm:$0xff] %vm692_vm2, %v674_v30  ;;  %v2052_v32 = vpop.f32.mrb[2].mxu0  ;;  %v1541_v30 = vld [vmem:[%s2855_s7] sm:$0xff] }
 0x101   : > { %v689_v33 = vadd.f32 %v2052_v32, %v589_v31  ;;  %v683_v34 = vpop.f32.mrb[3].mxu0  ;;  %v1542_v31 = vld [vmem:[%s2855_s7 + $0x8] sm:$0xff] }
 0x102   : > { %v684_v35 = vadd.f32 %v683_v34, %v584_v25  ;;  %v2185_v32 = vpack.c.bf16 %v1542_v31, %v1541_v30  ;;  %v1751_v31 = vld [vmem:[%s2861_s13 + $0x50] sm:$0xff] }
 0x103   : > { %696 = vst.msk [vmem:[#allocation2 + $0x18] sm:$0xff] %vm692_vm2, %v689_v33 }
 0x104   : > { %695 = vst.msk [vmem:[#allocation2 + $0x10] sm:$0xff] %vm692_vm2, %v684_v35  ;;  %v774_v37 = vpop.f32.mrb[4].mxu0 }
 0x105   : > { %v775_v38 = vadd.f32 %v1962_v36, %v774_v37  ;;  %v2063_v39 = vpop.f32.mrb[5].mxu0 }
 0x106   : > { %v892_v47 = vld [vmem:[#allocation2 + $0x8] sm:$0xff]  ;;  %v1544_v39 = vld [vmem:[%s2855_s7 + $0x18] sm:$0xff] }
 0x107   : > { %778 = vst.msk [vmem:[#allocation3] sm:$0xff] %vm692_vm2, %v775_v38  ;;  %v891_v40 = vld [vmem:[#allocation2] sm:$0xff] }
 0x108   : > { %2076 = vmatpush3.msra.mxu0 %v891_v40 }
 0x109   : > { %2080 = vmatprep.subr.mxu0 %v2388_v2 }
 0x10a   : > { %v894_v50 = vld [vmem:[#allocation2 + $0x18] sm:$0xff] }
 0x10b   : > { %v893_v42 = vld [vmem:[#allocation2 + $0x10] sm:$0xff] }
 0x10c   : > { %v879_v43 = vpop.f32.mrb[6].mxu0  ;;  %2086 = vmatpush3.msra.mxu1 %v893_v42 }
 0x10d   : > { %v880_v44 = vadd.f32 %v1964_v41, %v879_v43  ;;  %v2074_v45 = vpop.f32.mrb[7].mxu0  ;;  %2095 = vmatprep.subr.mxu1 %v2388_v2 }
 0x10e   : > { %v1220_v51 = vld [vmem:[#allocation3] sm:$0xff] }
 0x10f   : > { %v883_v46 = vmul.f32 0.35355338, %v880_v44 }
 0x111   : > { %887 = vrot.lane.b32.xlu1 %v883_v46, %s2391_s18  ;;  %885 = vrot.lane.b32.xlu0 %v883_v46, %s2392_s30 }
 0x112   : > { %2078 = vmatmul.mubr.msk.f32.vlgmr.msra.gmra.mrb[8].mxu0 %vm692_vm2, %v883_v46 }
 0x113   : > { %2081 = vmatpush3.msra.mxu0 %v892_v47  ;;  %2082 = vmatprep.mubr.msk.f32.mxu0 %vm2389_vm1, %v2388_v2 }
 0x114   : > { %2090 = vmatprep.subr.mxu0 %v2388_v2 }
 0x115   : > { %889 = vrot.lane.b32.xlu0 %v883_v46, %s2393_s26 }
 0x183   : > { %v888_v48 = vpop.permute.xlu1 %887  ;;  %v886_v49 = vpop.permute.xlu0 %885 }
 0x184   : > { %2083 = vmatmul.mubr.msk.f32.vlgmr.msra.gmra.mrb[10].mxu0 %vm692_vm2, %v886_v49  ;;  %2088 = vmatmul.mubr.msk.f32.vlgmr.msra.gmra.mrb[0].mxu1 %vm692_vm2, %v888_v48 }
 0x185   : > { %2091 = vmatpush3.msra.mxu0 %v894_v50  ;;  %2096 = vmatpush3.msra.mxu1 %v1220_v51 }
 0x186   : > { %2092 = vmatprep.mubr.msk.f32.mxu0 %vm2389_vm1, %v2388_v2  ;;  %2097 = vmatprep.mubr.msk.f32.mxu1 %vm2389_vm1, %v2388_v2 }
 0x187   : > { %v890_v52 = vpop.permute.xlu0 %889  ;;  %2105 = vmatprep.subr.mxu1 %v2388_v2  ;;  %2100 = vmatprep.subr.mxu0 %v2388_v2 }
 0x188   : > { %2093 = vmatmul.mubr.msk.f32.vlgmr.msra.gmra.mrb[12].mxu0 %vm692_vm2, %v890_v52 }
 0x189   : > { %2102 = vmatprep.mubr.msk.f32.mxu0 %vm2389_vm1, %v2388_v2 }
 0x1e5   : > { %v964_v53 = vpop.f32.mrb[8].mxu0 }
 0x1e6   : > { %v2079_v54 = vpop.f32.mrb[9].mxu0  ;;  %v1184_v55 = vsel %vm692_vm2, %v964_v53, -inf }
 0x1e7   : > { %1185 = vmax.xlane.f32.xlu1 %v1184_v55 }
 0x1f8   : > { %785 = vrot.lane.b32.xlu1 %v775_v38, %s2391_s18  ;;  %s2396_s18 = smov 24  }
 0x257   : > { %v1036_v56 = vpop.f32.mrb[10].mxu0  ;;  %v1108_v57 = vpop.f32.mrb[0].mxu1 }
 0x258   : > { %v2084_v58 = vpop.f32.mrb[11].mxu0  ;;  %v2089_v59 = vpop.f32.mrb[1].mxu1  ;;  %v1187_v60 = vsel %vm692_vm2, %v1036_v56, -inf  ;;  %v1190_v63 = vsel %vm692_vm2, %v1108_v57, -inf }
 0x259   : > { %1188 = vmax.xlane.f32.xlu0 %v1187_v60 }
 0x25b   : > { %v1180_v61 = vpop.f32.mrb[12].mxu0 }
 0x25c   : > { %v2094_v62 = vpop.f32.mrb[13].mxu0  ;;  %v1193_v0 = vsel %vm692_vm2, %v1180_v61, -inf }
 0x25d   : > { %1191 = vmax.xlane.f32.xlu0 %v1190_v63  ;;  %1194 = vmax.xlane.f32.xlu1 %v1193_v0  ;;  %v1974_v62 = vld [vmem:[%s2856_s8] ss:$0 sm:$0xff] }
 0x26e   : > { %790 = vrot.lane.b32.xlu1 %v775_v38, %s2393_s26 }
 0x273   : > { %780 = vrot.lane.b32.xlu0 %v775_v38, %s2392_s30  ;;  %v1543_v38 = vld [vmem:[%s2855_s7 + $0x10] sm:$0xff] }
 0x274   : > { %v1186_v1 = vpop.xlane.xlu1 %1185  ;;  %v2188_v40 = vpack.c.bf16 %v1544_v39, %v1543_v38 }
 0x275   : > { %v1196_v3 = vsub.f32 %v964_v53, %v1186_v1 }
 0x277   : > { %v1200_v4 = vmul.f32 1.442695, %v1196_v3 }
 0x278   : > { %v786_v5 = vpop.permute.xlu1 %785 }
 0x279   : > { %2287 = vpow2.f32 %v1200_v4  ;;  %789 = vst.msk [vmem:[#allocation3 + $0x10] sm:$0xff] %vm692_vm2, %v786_v5 }
 0x280   : > { %v1222_v8 = vld [vmem:[#allocation3 + $0x10] sm:$0xff] }
 0x283   : > { %v2288_v6 = vpop.eup %2287 }
 0x284   : > { %2098 = vmatmul.mubr.msk.f32.vlgmr.msra.gmra.mrb[2].mxu1 %vm692_vm2, %v2288_v6  ;;  %v1208_v29 = vsel %vm692_vm2, %v2288_v6, 0.0 }
 0x285   : > { %2106 = vmatpush3.msra.mxu1 %v1222_v8  ;;  %2107 = vmatprep.mubr.msk.f32.mxu1 %vm2389_vm1, %v2388_v2 }
 0x286   : > { %2184 = vmatprep.subr.bf16.mxu1 %v2390_v12 }
 0x2e6   : > { %v1189_v9 = vpop.xlane.xlu0 %1188 }
 0x2e7   : > { %v1197_v10 = vsub.f32 %v1036_v56, %v1189_v9 }
 0x2e9   : > { %v1202_v11 = vmul.f32 1.442695, %v1197_v10 }
 0x2ea   : > { %v1192_v13 = vpop.xlane.xlu0 %1191  ;;  %v1195_v14 = vpop.xlane.xlu1 %1194 }
 0x2eb   : > { %2289 = vpow2.f32 %v1202_v11  ;;  %v1198_v15 = vsub.f32 %v1108_v57, %v1192_v13  ;;  %v1199_v16 = vsub.f32 %v1180_v61, %v1195_v14  ;;  %v1657_v11 = vld [vmem:[%s2859_s11 + $0x8] sm:$0xff]  ;;  %v1659_v14 = vld [vmem:[%s2859_s11 + $0x18] sm:$0xff] }
 0x2ed   : > { %v1204_v17 = vmul.f32 1.442695, %v1198_v15  ;;  %v1206_v18 = vmul.f32 1.442695, %v1199_v16  ;;  %v1741_v16 = vld [vmem:[%s2861_s13] sm:$0xff] }
 0x2ee   : > { %v781_v19 = vpop.permute.xlu0 %780  ;;  %v791_v20 = vpop.permute.xlu1 %790 }
 0x2ef   : > { %2291 = vpow2.f32 %v1204_v17  ;;  %784 = vst.msk [vmem:[#allocation3 + $0x8] sm:$0xff] %vm692_vm2, %v781_v19  ;;  %794 = vst.msk [vmem:[#allocation3 + $0x18] sm:$0xff] %vm692_vm2, %v791_v20  ;;  %v1742_v17 = vld [vmem:[%s2861_s13 + $0x8] sm:$0xff]  ;;  %v1744_v20 = vld [vmem:[%s2861_s13 + $0x18] sm:$0xff] }
 0x2f0   : > { %2293 = vpow2.f32 %v1206_v18  ;;  %v1743_v18 = vld [vmem:[%s2861_s13 + $0x10] sm:$0xff]  ;;  %v2197_v19 = vpack.c.bf16 %v1742_v17, %v1741_v16 }
 0x2f5   : > { %v2290_v21 = vpop.eup %2289 }
 0x2f6   : > { %v1211_v22 = vsel %vm692_vm2, %v2290_v21, 0.0  ;;  %v1221_v23 = vld [vmem:[#allocation3 + $0x8] sm:$0xff]  ;;  %v1223_v24 = vld [vmem:[#allocation3 + $0x18] sm:$0xff] }
 0x2f7   : > { %1212 = vadd.xlane.f32.xlu0 %v1211_v22  ;;  %2101 = vmatpush3.msra.mxu0 %v1221_v23  ;;  %v1745_v22 = vld [vmem:[%s2861_s13 + $0x20] sm:$0xff]  ;;  %v1746_v23 = vld [vmem:[%s2861_s13 + $0x28] sm:$0xff] }
 0x2f8   : > { %2103 = vmatmul.mubr.msk.f32.vlgmr.msra.gmra.mrb[14].mxu0 %vm692_vm2, %v2290_v21  ;;  %2110 = vmatprep.subr.mxu0 %v2388_v2  ;;  %v2200_v21 = vpack.c.bf16 %v1744_v20, %v1743_v18 }
 0x2f9   : > { %v2292_v25 = vpop.eup %2291  ;;  %2111 = vmatpush3.msra.mxu0 %v1223_v24  ;;  %2112 = vmatprep.mubr.msk.f32.mxu0 %vm2389_vm1, %v2388_v2  ;;  %v2203_v24 = vpack.c.bf16 %v1746_v23, %v1745_v22 }
 0x2fa   : > { %v2294_v26 = vpop.eup %2293  ;;  %2108 = vmatmul.mubr.msk.f32.vlgmr.msra.gmra.mrb[4].mxu1 %vm692_vm2, %v2292_v25  ;;  %v1214_v27 = vsel %vm692_vm2, %v2292_v25, 0.0  ;;  %2190 = vmatprep.subr.bf16.mxu0 %v2390_v12  ;;  %v1747_v25 = vld [vmem:[%s2861_s13 + $0x30] sm:$0xff] }
 0x2fb   : > { %1215 = vadd.xlane.f32.xlu1 %v1214_v27  ;;  %v1217_v28 = vsel %vm692_vm2, %v2294_v26, 0.0  ;;  %2123 = vmatprep.mubr.msk.f32.mxu1 %vm2389_vm1, %v2388_v2 }
 0x2fc   : > { %1218 = vadd.xlane.f32.xlu0 %v1217_v28  ;;  %2113 = vmatmul.mubr.msk.f32.vlgmr.msra.gmra.mrb[16].mxu0 %vm692_vm2, %v2294_v26  ;;  %v1748_v26 = vld [vmem:[%s2861_s13 + $0x38] sm:$0xff]  ;;  %v1749_v28 = vld [vmem:[%s2861_s13 + $0x40] sm:$0xff] }
 0x2fd   : > { %2134 = vmatprep.mubr.msk.f32.mxu0 %vm2389_vm1, %v2388_v2  ;;  %2186 = vmatpush3.bf16.msra.mxu1 %v2185_v32  ;;  %v2206_v27 = vpack.c.bf16 %v1748_v26, %v1747_v25  ;;  %v1752_v32 = vld [vmem:[%s2861_s13 + $0x58] sm:$0xff] }
 0x2fe   : > { %2187 = vmatprep.subr.bf16.mxu1 %v2390_v12 }
 0x300   : > { %1209 = vadd.xlane.f32.xlu0 %v1208_v29  ;;  %v1750_v29 = vld [vmem:[%s2861_s13 + $0x48] sm:$0xff] }
 0x301   : > { %2189 = vmatpush3.bf16.msra.mxu1 %v2188_v40  ;;  %v2209_v30 = vpack.c.bf16 %v1750_v29, %v1749_v28 }
 0x302   : > { %2196 = vmatprep.subr.bf16.mxu1 %v2390_v12 }
 0x357   : > { %v1293_v33 = vpop.f32.mrb[2].mxu1 }
 0x358   : > { %v2099_v34 = vpop.f32.mrb[3].mxu1 }
 0x359   : > { %v1753_v34 = vld [vmem:[%s2861_s13 + $0x60] sm:$0xff] }
 0x384   : > { %v1213_v35 = vpop.xlane.xlu0 %1212 }
 0x385   : > { %2295 = vrcp.f32 %v1213_v35  ;;  %v1754_v35 = vld [vmem:[%s2861_s13 + $0x68] sm:$0xff] }
 0x388   : > { %v1216_v36 = vpop.xlane.xlu1 %1215 }
 0x389   : > { %v1219_v37 = vpop.xlane.xlu0 %1218  ;;  %2297 = vrcp.f32 %v1216_v36  ;;  %v2215_v36 = vpack.c.bf16 %v1754_v35, %v1753_v34 }
 0x38a   : > { %2299 = vrcp.f32 %v1219_v37 }
 0x38d   : > { %v1210_v53 = vpop.xlane.xlu0 %1209 }
 0x38e   : > { %2301 = vrcp.f32 %v1210_v53  ;;  %v1980_v53 = vld [vmem:[%s2862_s14] ss:$0 sm:$0xff] }
 0x38f   : > { %v2296_v41 = vpop.eup %2295 }
 0x393   : > { %v2298_v45 = vpop.eup %2297 }
 0x394   : > { %v2300_v49 = vpop.eup %2299 }
 0x398   : > { %v2302_v54 = vpop.eup %2301 }
 0x399   : > { %v1520_v55 = vmul.f32 %v2302_v54, %v1293_v33  ;;  %v2212_v33 = vpack.c.bf16 %v1752_v32, %v1751_v31 }
 0x3cb   : > { %v1366_v42 = vpop.f32.mrb[14].mxu0 }
 0x3cc   : > { %v1521_v43 = vmul.f32 %v2296_v41, %v1366_v42  ;;  %v2104_v44 = vpop.f32.mrb[15].mxu0  ;;  %v1976_v41 = vld [vmem:[%s2857_s9] ss:$0 sm:$0xff] }
 0x3cd   : > { %v1439_v46 = vpop.f32.mrb[4].mxu1 }
 0x3ce   : > { %v1522_v47 = vmul.f32 %v2298_v45, %v1439_v46  ;;  %v2109_v48 = vpop.f32.mrb[5].mxu1  ;;  %1525 = vrot.lane.b32.xlu1 %v1521_v43, %s2394_s23  ;;  %v1977_v43 = vld [vmem:[%s2858_s10] ss:$0 sm:$0xff]  ;;  %v1756_v46 = vld [vmem:[%s2861_s13 + $0x78] sm:$0xff]  ;;  %s2894_s23 = sld [smem:[#allocation18_spill]] }
 0x3cf   : > { %v1512_v50 = vpop.f32.mrb[16].mxu0  ;;  %v1978_v48 = vld [vmem:[%s2860_s12] ss:$0 sm:$0xff] }
 0x3d0   : > { %v1523_v51 = vmul.f32 %v2300_v49, %v1512_v50  ;;  %1529 = vrot.lane.b32.xlu0 %v1522_v47, %s2395_s0  ;;  %v2114_v52 = vpop.f32.mrb[17].mxu0  ;;  %s551_s0 = sand.u32 1, %s2369_s25  }
 0x3d1   : > { %s1866_s30 = scalar_lea.sflag [#allocation5], %s551_s0 }
 0x3d2   : > { %1533 = vrot.lane.b32.xlu1 %v1523_v51, %s2396_s18  ;;  %s1955_s18 = sshll.u32 %s551_s0, 3 }
 0x3d3   : > { %s553_s21 = scalar_lea.vmem [#allocation4], %s1955_s18  ;;  %s2311_s18 = sshll.u32 %s2397_s27, 4  ;;  %s2312_s18 = int_to_ptr.vmem [resolvable:$false] %s2311_s18 }
 0x3d4   : > { %s1880_s22 = sshll.u32 %s553_s21, 4  ;;  %s2800_s2 = scalar_lea.hbm %s2894_s23, %s1984_s29  ;;  %s2802_s22 = int_to_ptr.vmem [resolvable:$true] %s1880_s22 }
 0x3d5   : > { %s2307_s26 = scalar_lea.vmem %s2802_s22, 128  ;;  %s2313_s28 = scalar_lea.vmem %s2312_s18, 256 }
 0x3d6   : > { %p2308_p12 = scmp.ne.s32.totalorder %s2802_s22, %s2307_s26  ;;  %p2314_p1 = scmp.lt.s32.totalorder %s2802_s22, %s2312_s18 }
 0x3d7   : > { %p2315_p2 = scmp.lt.s32.totalorder %s2313_s28, %s2307_s26 }
 0x3d8   : > { %p2309_p13 = pnand %p2308_p12, %p2528_p4 }
 0x3d9   : > { %p2316_p3 = por %p2315_p2, %p2314_p1 }
 0x3da   : > { %p2310_p0 = pneg %p2309_p13 }
 0x3dc   : > { %p2317_p5 = pnand %p2316_p3, %p2310_p0 }
 0x440   : > { %v1526_v56 = vpop.permute.xlu1 %1525 }
 0x441   : > { %v1536_v57 = vsel %vm692_vm2, %v1520_v55, %v1526_v56 }
 0x442   : > { %v1530_v58 = vpop.permute.xlu0 %1529 }
 0x443   : > { %v1538_v59 = vsel %vm1537_vm3, %v1536_v57, %v1530_v58 }
 0x444   : > { %v1534_v60 = vpop.permute.xlu1 %1533 }
 0x445   : > { %v1540_v61 = vsel %vm1539_vm4, %v1538_v59, %v1534_v60 }
 0x446   : > { %2124 = vmatmul.mubr.msk.f32.vlgmr.msra.gmra.mrb[6].mxu1 %vm591_vm0, %v1540_v61 }
 0x447   : > { %2169 = vmatprep.mubr.msk.f32.mxu1 %vm2389_vm1, %v2388_v2  ;;  %v1656_v2 = vld [vmem:[%s2859_s11] sm:$0xff]  ;;  %2198 = vmatpush3.bf16.msra.mxu1 %v2197_v19 }
 0x448   : > { %v2191_v13 = vpack.c.bf16 %v1657_v11, %v1656_v2  ;;  %2199 = vmatprep.subr.bf16.mxu1 %v2390_v12 }
 0x44a   : > { %2192 = vmatpush3.bf16.msra.mxu0 %v2191_v13 }
 0x44b   : > { %2193 = vmatprep.subr.bf16.mxu0 %v2390_v12  ;;  %2201 = vmatpush3.bf16.msra.mxu1 %v2200_v21 }
 0x44c   : > { %2202 = vmatprep.subr.bf16.mxu1 %v2390_v12 }
 0x44f   : > { %2204 = vmatpush3.bf16.msra.mxu1 %v2203_v24 }
 0x450   : > { %2205 = vmatprep.subr.bf16.mxu1 %v2390_v12 }
 0x453   : > { %2207 = vmatpush3.bf16.msra.mxu1 %v2206_v27 }
 0x454   : > { %2208 = vmatprep.subr.bf16.mxu1 %v2390_v12 }
 0x457   : > { %2210 = vmatpush3.bf16.msra.mxu1 %v2209_v30 }
 0x458   : > { %2211 = vmatprep.subr.bf16.mxu1 %v2390_v12 }
 0x45b   : > { %2213 = vmatpush3.bf16.msra.mxu1 %v2212_v33 }
 0x45c   : > { %2214 = vmatprep.subr.bf16.mxu1 %v2390_v12 }
 0x45f   : > { %2216 = vmatpush3.bf16.msra.mxu1 %v2215_v36 }
 0x460   : > { %2217 = vmatprep.subr.bf16.mxu1 %v2390_v12  ;;  %v1755_v12 = vld [vmem:[%s2861_s13 + $0x70] sm:$0xff] }
 0x461   : > { %v2218_v47 = vpack.c.bf16 %v1756_v46, %v1755_v12 }
 0x463   : > { %2219 = vmatpush3.bf16.msra.mxu1 %v2218_v47 }
 0x519   : > { %v1621_v63 = vpop.f32.mrb[6].mxu1 }
 0x51a   : > { %v1622_v0 = vadd.f32 %v1974_v62, %v1621_v63  ;;  %v2125_v1 = vpop.f32.mrb[7].mxu1 }
 0x51c   : > { %v1625_v3 = vadd.f32 %v1622_v0, %v2567_v7  ;;  %v1658_v7 = vld [vmem:[%s2859_s11 + $0x10] sm:$0xff] }
 0x51d   : > { %v2194_v15 = vpack.c.bf16 %v1659_v14, %v1658_v7 }
 0x51e   : > { %v1628_v4 = vsel %vm591_vm0, %v1625_v3, 0.0 }
 0x51f   : > { %1629 = vadd.xlane.f32.xlu1 %v1628_v4  ;;  %2195 = vmatpush3.bf16.msra.mxu0 %v2194_v15 }
 0x5ac   : > { %v1630_v5 = vpop.xlane.xlu1 %1629 }
 0x5ad   : > { %v1632_v6 = vmul.f32 0.03125, %v1630_v5  ;;  %v1981_v5 = vld [vmem:[%s2863_s15] ss:$0 sm:$0xff] }
 0x5af   : > { %v1633_v8 = vsub.f32 %v1625_v3, %v1632_v6 }
 0x5b1   : > { %v1634_v9 = vmul.f32 %v1633_v8, %v1633_v8 }
 0x5b3   : > { %v1635_v10 = vsel %vm591_vm0, %v1634_v9, 0.0 }
 0x5b4   : > { %1636 = vadd.xlane.f32.xlu0 %v1635_v10 }
 0x641   : > { %v1637_v37 = vpop.xlane.xlu0 %1636 }
 0x642   : > { %v1638_v38 = vmul.f32 0.03125, %v1637_v37 }
 0x644   : > { %v1639_v39 = vadd.f32 1e-05, %v1638_v38 }
 0x646   : > { %2303 = vrsqrt.f32 %v1639_v39 }
 0x650   : > { %v2304_v40 = vpop.eup %2303 }
 0x651   : > { %v1641_v42 = vmul.f32 %v2304_v40, %v1633_v8  ;;  %v1982_v8 = vld [vmem:[%s2893_s24] ss:$0 sm:$0xff] }
 0x653   : > { %v1648_v44 = vmul.f32 %v1976_v41, %v1641_v42 }
 0x655   : > { %v1655_v45 = vadd.f32 %v1977_v43, %v1648_v44 }
 0x657   : > { %2135 = vmatmul.mubr.msk.f32.vlgmr.msra.gmra.mrb[18].mxu0 %vm591_vm0, %v1655_v45 }
 0x72a   : > { %v1736_v49 = vpop.f32.mrb[18].mxu0 }
 0x72b   : > { %v1737_v50 = vadd.f32 %v1978_v48, %v1736_v49  ;;  %v2136_v51 = vpop.f32.mrb[19].mxu0 }
 0x72d   : > { %v1740_v52 = vmax.f32 %v1737_v50, 0.0 }
 0x72f   : > { %2170 = vmatmul.mubr.f32.vlgmr.msra.gmra.mrb[8].mxu1 %v1740_v52 }
 0x802   : > { %v1830_v54 = vpop.f32.mrb[8].mxu1 }
 0x803   : > { %v1831_v55 = vadd.f32 %v1980_v53, %v1830_v54  ;;  %v2171_v56 = vpop.f32.mrb[9].mxu1 }
 0x805   : > { %v1834_v57 = vadd.f32 %v1831_v55, %v1655_v45 }
 0x807   : > { %v1837_v58 = vsel %vm591_vm0, %v1834_v57, 0.0 }
 0x808   : > { %1838 = vadd.xlane.f32.xlu0 %v1837_v58 }
 0x895   : > { %v1839_v59 = vpop.xlane.xlu0 %1838 }
 0x896   : > { %v1840_v60 = vmul.f32 0.03125, %v1839_v59 }
 0x898   : > { %v1841_v61 = vsub.f32 %v1834_v57, %v1840_v60 }
 0x89a   : > { %v1842_v62 = vmul.f32 %v1841_v61, %v1841_v61 }
 0x89c   : > { %v1843_v63 = vsel %vm591_vm0, %v1842_v62, 0.0 }
 0x89d   : > { %1844 = vadd.xlane.f32.xlu1 %v1843_v63 }
 0x92a   : > { %v1845_v0 = vpop.xlane.xlu1 %1844 }
 0x92b   : > { %v1846_v1 = vmul.f32 0.03125, %v1845_v0 }
 0x92d   : > { %v1847_v3 = vadd.f32 1e-05, %v1846_v1 }
 0x92f   : > { %2305 = vrsqrt.f32 %v1847_v3 }
 0x939   : > { %v2306_v4 = vpop.eup %2305 }
 0x93a   : > { %v1849_v6 = vmul.f32 %v2306_v4, %v1841_v61 }
 0x93c   : > { %v1856_v9 = vmul.f32 %v1981_v5, %v1849_v6 }
 0x93e   : > { %v1863_v10 = vadd.f32 %v1982_v8, %v1856_v9 }
 0x940   : > { %1864 = vst.msk [vmem:[%s553_s21] sm:$0xff] %vm591_vm0, %v1863_v10 }
 0x941   : > { %2320 = shalt.err (!%p2317_p5)
}
 0x942   : > { %s2321_s0 = scalar_lea.hbm %s2800_s2, 128  ;;  %s2325_s29 = scalar_lea.hbm %s2894_s23, 256 }
 0x943   : > { %p2322_p6 = scmp.ne.s32.totalorder %s2800_s2, %s2321_s0  ;;  %p2326_p10 = scmp.lt.u32.totalorder %s2800_s2, %s2894_s23 }
 0x944   : > { %p2327_p11 = scmp.lt.u32.totalorder %s2325_s29, %s2321_s0  ;;  %p2329_p13 = scmp.lt.u32.totalorder %s2321_s0, %s2800_s2 }
 0x945   : > { %p2323_p7 = pnand %p2322_p6, %p2528_p4 }
 0x946   : > { %p2328_p12 = por %p2327_p11, %p2326_p10 }
 0x947   : > { %p2324_p9 = pneg %p2323_p7 }
 0x948   : > { %p2330_p0 = por %p2329_p13, %p2328_p12 }
 0x94a   : > { %p2331_p1 = pnand %p2330_p0, %p2324_p9 }
 0x94c   : > { %2334 = shalt.err (!%p2331_p1)
}
 0x94d   : > { %2220 = dma.vmem_to_hbm [thread:$0]  (%p2528_p4), %s2802_s22, 128, %s2800_s2, %s1866_s30  }
 0x94e PF: > { %s2895_s20 = sld [smem:[#allocation10_spill]]  ;;  %s2896_s26 = sld [smem:[#allocation7_spill]] }
 0x954   : > { %p2226_p2 = scmp.ge.s32.totalorder %s2895_s20, 2  ;;  %s1892_s18 = sand.u32 1, %s2896_s26  }
 0x955   : > { %s1893_s28 = scalar_lea.sflag [#allocation5], %s1892_s18 }
 0x956   : > { %p2223_p3 = pnand %p2226_p2, %p2535_p8 }
 0x958   : > { %2360 = dma.done.wait (!%p2223_p3), %s1893_s28, 128  }
 0x959   : > { %2362 = vsyncadd (!%p2223_p3), %s1893_s28, 4294967168  ;;  %s30_s29 = sadd.s32 1, %s2895_s20   ;;  %s2898_s0 = sld [smem:[#allocation8_spill]] }
 0x95a   : > { %p27_p5 = scmp.ge.s32.totalorder %s30_s29, 4   ;;  %s2899_s26 = sld [smem:[#allocation13_spill]] }
 0x95b   : > { %s2900_s27 = sld [smem:[#allocation9_spill]]  ;;  %s2901_s28 = sld [smem:[#allocation11_spill]] }
 0x95c   : > { %s2902_s24 = smov %s2369_s25  ;;  %29 = sbr.rel (!%p27_p5) target bundleno = 10 (0xa), region = 131 }
 0x95f   : > { %s2903_s25 = smov %s2898_s0 }
 0x963   :  { %1898 = vsyncpa [#allocation5], 1 }
 0x964   :  { %1900 = vsyncpa [#allocation5 + $0x1], 1 }

// kernel: tpu_custom_call.1
= control target key start
LH: loop header
LB: loop body
LE: loop exit
PB: predicated region body
PF: predicated region fallthrough
CT: control target
= control target key end

     0   :  { %s2848_s0 = inlined_call_operand.vmem [shape: f32[2,8,32], index: 0, kind: input, shape index: {}]   ;;  %s2849_s1 = inlined_call_operand.vmem [shape: f32[32,32], index: 1, kind: input, shape index: {}]   ;;  %s2850_s2 = inlined_call_operand.vmem [shape: f32[1,32], index: 2, kind: input, shape index: {}]   ;;  %s2851_s3 = inlined_call_operand.vmem [shape: f32[32,32], index: 3, kind: input, shape index: {}]   ;;  %s2852_s4 = inlined_call_operand.vmem [shape: f32[32,1], index: 4, kind: input, shape index: {}]   ;;  %s2853_s5 = inlined_call_operand.vmem [shape: f32[32,32], index: 5, kind: input, shape index: {}]   ;;  %s2854_s6 = inlined_call_operand.vmem [shape: f32[1,32], index: 6, kind: input, shape index: {}]   ;;  %s2855_s7 = inlined_call_operand.vmem [shape: f32[32,32], index: 7, kind: input, shape index: {}]   ;;  %s2856_s8 = inlined_call_operand.vmem [shape: f32[1,32], index: 8, kind: input, shape index: {}]   ;;  %s2857_s9 = inlined_call_operand.vmem [shape: f32[1,32], index: 9, kind: input, shape index: {}]   ;;  %s2858_s10 = inlined_call_operand.vmem [shape: f32[1,32], index: 10, kind: input, shape index: {}]   ;;  %s2859_s11 = inlined_call_operand.vmem [shape: f32[32,128], index: 11, kind: input, shape index: {}]   ;;  %s2860_s12 = inlined_call_operand.vmem [shape: f32[1,128], index: 12, kind: input, shape index: {}]   ;;  %s2861_s13 = inlined_call_operand.vmem [shape: f32[128,32], index: 13, kind: input, shape index: {}]   ;;  %s2862_s14 = inlined_call_operand.vmem [shape: f32[1,32], index: 14, kind: input, shape index: {}]   ;;  %s2863_s15 = inlined_call_operand.vmem [shape: f32[1,32], index: 15, kind: input, shape index: {}]   ;;  %s2864_s16 = inlined_call_operand.vmem [shape: f32[1,32], index: 16, kind: input, shape index: {}]   ;;  %s2865_s17 = inlined_call_operand.hbm [shape: f32[2,8,32], index: 17, kind: output, shape index: {}]  }
   0x1   :  { %2875 = sst [smem:[#allocation14_spill]] %s2848_s0 }
   0x2   :  { %2876 = sst [smem:[#allocation15_spill]] %s2849_s1 }
   0x3   :  { %2877 = sst [smem:[#allocation16_spill]] %s2850_s2 }
   0x4   :  { %2878 = sst [smem:[#allocation17_spill]] %s2864_s16 }
   0x5   :  { %2879 = sst [smem:[#allocation18_spill]] %s2865_s17 }
   0x6   :  { %22 = vsyncpa [#allocation5], 0 }
   0x7   :  { %24 = vsyncpa [#allocation5 + $0x1], 0  ;;  %s2488_s24 = smov 0   ;;  %s2490_s25 = smov 0  }
   0x8   :  { %s2492_s26 = smov 0   ;;  %s2494_s27 = smov 0  }
   0x9   :  { %s2496_s28 = smov 0   ;;  %s2498_s29 = smov 0  }
   0xa LB: > { %2880 = sst [smem:[#allocation7_spill]] %s2365_s24  ;;  %s1950_s0 = sadd.s32 4294967295, %s2385_s29   ;;  %s2385_s29 = sphi %s2498_s29, %s30_s29   ;;  %s2381_s28 = sphi %s2496_s28, %s2901_s28   ;;  %s2377_s27 = sphi %s2494_s27, %s2900_s27   ;;  %s2373_s26 = sphi %s2492_s26, %s2899_s26   ;;  %s2369_s25 = sphi %s2490_s25, %s2903_s25   ;;  %s2365_s24 = sphi %s2488_s24, %s2902_s24  }
   0xb   : > { %2881 = sst [smem:[#allocation8_spill]] %s2373_s26  ;;  %s1951_s30 = sadd.s32 4294967294, %s2385_s29  }
   0xc   : > { %2882 = sst [smem:[#allocation9_spill]] %s2381_s28  ;;  %s42_s18 = sadd.s32 1, %s2381_s28 }
   0xd   : > { %2883 = sst [smem:[#allocation10_spill]] %s2385_s29  ;;  %s413_s19 = sadd.s32 1, %s2373_s26 }
   0xe   : > { %p44_p0 = scmp.ge.s32.totalorder %s42_s18, 2  ;;  %p423_p1 = scmp.ne.s32.totalorder %s2373_s26, %s2369_s25 }
   0xf   : > { %p424_p2 = scmp.eq.s32.totalorder %s1950_s0, 1  ;;  %p429_p3 = scmp.ne.s32.totalorder %s2369_s25, %s2365_s24 }
  0x10   : > { %s2905_s18 = smov (%p44_p0, %s42_s18), 0  ;;  %p430_p5 = scmp.eq.s32.totalorder %s1951_s30, 1 }
  0x11   : > { %2884 = sst [smem:[#allocation11_spill]] %s2905_s18  ;;  %p2528_p4 = por %p424_p2, %p423_p1 }
  0x12   : > { %s408_s20 = ssub.s32 %s2381_s28, %s2905_s18  ;;  %p1954_p6 = scmp.ge.s32.totalorder %s2385_s29, 1 }
  0x13   : > { %p411_p7 = scmp.eq.s32.totalorder %s408_s20, 0  ;;  %p2535_p8 = por %p430_p5, %p429_p3 }
  0x14   : > { %p503_p9 = scmp.lt.s32.totalorder %s2385_s29, 3 }
  0x15   : > { %s2886_s21 = scalar_select %p2535_p8, 1, 0 }
  0x16   : > { %s2541_s22 = scalar_select %p411_p7, %s2373_s26, %s413_s19  }
  0x17   : > { %2887 = sst [smem:[#allocation12_spill]] %s2886_s21  ;;  %p504_p10 = pnand %p1954_p6, %p503_p9 }
  0x18   : > { %2888 = sst [smem:[#allocation13_spill]] %s2541_s22  ;;  %p554_p11 = scmp.lt.s32.totalorder (!%p504_p10), %s2377_s27, 1  ;;  %vm591_vm0 = vcmask (!%p504_p10), 261120   ;;  %v563_v0 = vld [vmem:[%s2851_s3] sm:$0xff] (!%p504_p10)  ;;  %v2387_v1 = vmov (!%p504_p10), 0   ;;  %v2388_v2 = vmov (!%p504_p10), 0.0  }
  0x19   : > { %507 = sbr.rel (%p504_p10) target bundleno = 2382 (0x94e), region = 88  ;;  %2047 = vmatprep.mubr.msk.f32.mxu0 (!%p504_p10), %vm591_vm0, %v563_v0  ;;  %2285 = vset.pattern.permute.xlu0 (!%p504_p10), %v2387_v1  ;;  %vm2389_vm1 = vmmov (!%p504_p10), 0   ;;  %v567_v3 = vld [vmem:[%s2852_s4] sm:$0xff] (!%p504_p10)  ;;  %v569_v4 = vld [vmem:[%s2852_s4 + $0x10] sm:$0xff] (!%p504_p10)  ;;  %s2889_s26 = sld [smem:[#allocation14_spill]] (!%p504_p10)  ;;  %v698_v6 = vld [vmem:[%s2853_s5 + $0x8] sm:$0xff] (!%p504_p10) }
  0x1a   : > { %2286 = vset.pattern.permute.xlu1 (!%p504_p10), %v2387_v1  ;;  %2085 = vmatprep.subr.mxu1 (!%p504_p10), %v2388_v2  ;;  %v697_v5 = vld [vmem:[%s2853_s5] sm:$0xff] (!%p504_p10)  ;;  %v568_v8 = vld [vmem:[%s2852_s4 + $0x8] sm:$0xff] (!%p504_p10)  ;;  %v570_v9 = vld [vmem:[%s2852_s4 + $0x18] sm:$0xff] (!%p504_p10)  ;;  %v2390_v12 = vmov (!%p504_p10), 0.0|0.0   ;;  %vm692_vm2 = vcmask (!%p504_p10), 64512   ;;  %s2892_s2 = sld [smem:[#allocation16_spill]] (!%p504_p10) }
  0x1b   : > { %2087 = vmatprep.mubr.msk.f32.mxu1 (!%p504_p10), %vm2389_vm1, %v2388_v2  ;;  %573 = vperm.xlu0 (!%p504_p10), %2285, %v567_v3   ;;  %v564_v10 = vld [vmem:[%s2851_s3 + $0x8] sm:$0xff] (!%p504_p10)  ;;  %v2173_v11 = vpack.c.bf16 (!%p504_p10), %v698_v6, %v697_v5  ;;  %v565_v13 = vld [vmem:[%s2851_s3 + $0x10] sm:$0xff] (!%p504_p10)  ;;  %v700_v15 = vld [vmem:[%s2853_s5 + $0x18] sm:$0xff] (!%p504_p10)  ;;  %s2391_s18 = smov (!%p504_p10), 112   ;;  %s2394_s23 = smov (!%p504_p10), 8   ;;  %vm1537_vm3 = vcmask (!%p504_p10), 130048  }
  0x1c   : > { %583 = vperm.xlu1 (!%p504_p10), %2286, %v569_v4   ;;  %v699_v14 = vld [vmem:[%s2853_s5 + $0x10] sm:$0xff] (!%p504_p10)  ;;  %v566_v16 = vld [vmem:[%s2851_s3 + $0x18] sm:$0xff] (!%p504_p10)  ;;  %v1962_v36 = vld [vmem:[%s2854_s6] ss:$0 sm:$0xff] (!%p504_p10)  ;;  %s2395_s0 = smov (!%p504_p10), 16   ;;  %vm1539_vm4 = vcmask (!%p504_p10), 195584  }
  0x1d   : > { %v2176_v17 = vpack.c.bf16 (!%p504_p10), %v700_v15, %v699_v14  ;;  %s2893_s24 = sld [smem:[#allocation17_spill]] (!%p504_p10)  ;;  %s1984_s29 = sshll.u32 (!%p504_p10), %s2377_s27, 7 }
  0x1f   : > { %578 = vperm.xlu0 (!%p504_p10), %2285, %v568_v8  }
  0x20   : > { %s555_s30 = scalar_select %p554_p11, %s2377_s27, 1  ;;  %588 = vperm.xlu1 %2286, %v570_v9   ;;  %v1964_v41 = vld [vmem:[%s2892_s2] ss:$0 sm:$0xff] }
  0x21   : > { %s2397_s27 = smov [#allocation4]  }
  0x22   : > { %s1956_s19 = sshll.u32 %s555_s30, 3  ;;  %s2392_s30 = smov 120  }
  0x23   : > { %s557_s21 = scalar_lea.vmem %s2889_s26, %s1956_s19  ;;  %s2890_s26 = sld [smem:[#allocation15_spill]] }
  0x24   : > { %v2567_v7 = vld [vmem:[%s557_s21] sm:$0xff] }
  0x25   : > { %2045 = vmatprep.subr.msk.mxu0 %vm591_vm0, %v2567_v7 }
  0x26   : > { %2046 = vmatpush3.xpose.msk.msra.mxu0 %vm591_vm0, %v2567_v7 }
  0x27   : > { %2172 = vmatprep.subr.bf16.mxu0 %v2390_v12 }
  0x29   : > { %2048 = vmatmul.mubr.msk.f32.vlgmr.msra.gmra.mrb[0].mxu0 %vm591_vm0, %v564_v10  ;;  %s2891_s16 = smov %s2890_s26  ;;  %v798_v18 = vld [vmem:[%s2890_s26] sm:$0xff]  ;;  %s2393_s26 = smov 104  }
  0x2a   : > { %2174 = vmatpush3.bf16.msra.mxu0 %v2173_v11  ;;  %2050 = vmatprep.mubr.msk.f32.mxu0 %vm591_vm0, %v565_v13  ;;  %v799_v19 = vld [vmem:[%s2891_s16 + $0x8] sm:$0xff]  ;;  %v800_v21 = vld [vmem:[%s2891_s16 + $0x10] sm:$0xff]  ;;  %v801_v22 = vld [vmem:[%s2891_s16 + $0x18] sm:$0xff] }
  0x2b   : > { %2175 = vmatprep.subr.bf16.mxu0 %v2390_v12  ;;  %v2179_v20 = vpack.c.bf16 %v799_v19, %v798_v18  ;;  %v2182_v23 = vpack.c.bf16 %v801_v22, %v800_v21 }
  0x2d   : > { %2051 = vmatmul.mubr.msk.f32.gmra.mrb[2].mxu0 %vm591_vm0, %v566_v16 }
  0x2e   : > { %2177 = vmatpush3.bf16.msra.mxu0 %v2176_v17  ;;  %2061 = vmatprep.mubr.msk.f32.mxu0 %vm2389_vm1, %v2388_v2 }
  0x2f   : > { %2178 = vmatprep.subr.bf16.mxu0 %v2390_v12 }
  0x31   : > { %2062 = vmatmul.mubr.msk.f32.vlgmr.msra.gmra.mrb[4].mxu0 %vm591_vm0, %v2567_v7 }
  0x32   : > { %2180 = vmatpush3.bf16.msra.mxu0 %v2179_v20  ;;  %2072 = vmatprep.mubr.msk.f32.mxu0 %vm2389_vm1, %v2388_v2 }
  0x33   : > { %2181 = vmatprep.subr.bf16.mxu0 %v2390_v12 }
  0x36   : > { %2183 = vmatpush3.bf16.msra.mxu0 %v2182_v23 }
  0x37   : > { %2075 = vmatprep.subr.mxu0 %v2388_v2 }
  0x39   : > { %2073 = vmatmul.mubr.msk.f32.vlgmr.msra.gmra.mrb[6].mxu0 %vm591_vm0, %v2567_v7 }
  0x3a   : > { %2077 = vmatprep.mubr.msk.f32.mxu0 %vm2389_vm1, %v2388_v2 }
  0x9a   : > { %v574_v24 = vpop.permute.xlu0 %573 }
  0x9b   : > { %v584_v25 = vpop.permute.xlu1 %583 }
  0x9e   : > { %v579_v26 = vpop.permute.xlu0 %578 }
  0x9f   : > { %v589_v31 = vpop.permute.xlu1 %588 }
  0xfc   : > { %v2049_v27 = vpop.f32.mrb[0].mxu0 }
  0xfd   : > { %v679_v28 = vadd.f32 %v2049_v27, %v579_v26  ;;  %v673_v29 = vpop.f32.mrb[1].mxu0 }
  0xfe   : > { %v674_v30 = vadd.f32 %v673_v29, %v574_v24 }
  0xff   : > { %694 = vst.msk [vmem:[#allocation2 + $0x8] sm:$0xff] %vm692_vm2, %v679_v28 }
 0x100   : > { %693 = vst.msk [vmem:[#allocation2] sm:$0xff] %vm692_vm2, %v674_v30  ;;  %v2052_v32 = vpop.f32.mrb[2].mxu0  ;;  %v1541_v30 = vld [vmem:[%s2855_s7] sm:$0xff] }
 0x101   : > { %v689_v33 = vadd.f32 %v2052_v32, %v589_v31  ;;  %v683_v34 = vpop.f32.mrb[3].mxu0  ;;  %v1542_v31 = vld [vmem:[%s2855_s7 + $0x8] sm:$0xff] }
 0x102   : > { %v684_v35 = vadd.f32 %v683_v34, %v584_v25  ;;  %v2185_v32 = vpack.c.bf16 %v1542_v31, %v1541_v30  ;;  %v1751_v31 = vld [vmem:[%s2861_s13 + $0x50] sm:$0xff] }
 0x103   : > { %696 = vst.msk [vmem:[#allocation2 + $0x18] sm:$0xff] %vm692_vm2, %v689_v33 }
 0x104   : > { %695 = vst.msk [vmem:[#allocation2 + $0x10] sm:$0xff] %vm692_vm2, %v684_v35  ;;  %v774_v37 = vpop.f32.mrb[4].mxu0 }
 0x105   : > { %v775_v38 = vadd.f32 %v1962_v36, %v774_v37  ;;  %v2063_v39 = vpop.f32.mrb[5].mxu0 }
 0x106   : > { %v892_v47 = vld [vmem:[#allocation2 + $0x8] sm:$0xff]  ;;  %v1544_v39 = vld [vmem:[%s2855_s7 + $0x18] sm:$0xff] }
 0x107   : > { %778 = vst.msk [vmem:[#allocation3] sm:$0xff] %vm692_vm2, %v775_v38  ;;  %v891_v40 = vld [vmem:[#allocation2] sm:$0xff] }
 0x108   : > { %2076 = vmatpush3.msra.mxu0 %v891_v40 }
 0x109   : > { %2080 = vmatprep.subr.mxu0 %v2388_v2 }
 0x10a   : > { %v894_v50 = vld [vmem:[#allocation2 + $0x18] sm:$0xff] }
 0x10b   : > { %v893_v42 = vld [vmem:[#allocation2 + $0x10] sm:$0xff] }
 0x10c   : > { %v879_v43 = vpop.f32.mrb[6].mxu0  ;;  %2086 = vmatpush3.msra.mxu1 %v893_v42 }
 0x10d   : > { %v880_v44 = vadd.f32 %v1964_v41, %v879_v43  ;;  %v2074_v45 = vpop.f32.mrb[7].mxu0  ;;  %2095 = vmatprep.subr.mxu1 %v2388_v2 }
 0x10e   : > { %v1220_v51 = vld [vmem:[#allocation3] sm:$0xff] }
 0x10f   : > { %v883_v46 = vmul.f32 0.35355338, %v880_v44 }
 0x111   : > { %887 = vrot.lane.b32.xlu1 %v883_v46, %s2391_s18  ;;  %885 = vrot.lane.b32.xlu0 %v883_v46, %s2392_s30 }
 0x112   : > { %2078 = vmatmul.mubr.msk.f32.vlgmr.msra.gmra.mrb[8].mxu0 %vm692_vm2, %v883_v46 }
 0x113   : > { %2081 = vmatpush3.msra.mxu0 %v892_v47  ;;  %2082 = vmatprep.mubr.msk.f32.mxu0 %vm2389_vm1, %v2388_v2 }
 0x114   : > { %2090 = vmatprep.subr.mxu0 %v2388_v2 }
 0x115   : > { %889 = vrot.lane.b32.xlu0 %v883_v46, %s2393_s26 }
 0x183   : > { %v888_v48 = vpop.permute.xlu1 %887  ;;  %v886_v49 = vpop.permute.xlu0 %885 }
 0x184   : > { %2083 = vmatmul.mubr.msk.f32.vlgmr.msra.gmra.mrb[10].mxu0 %vm692_vm2, %v886_v49  ;;  %2088 = vmatmul.mubr.msk.f32.vlgmr.msra.gmra.mrb[0].mxu1 %vm692_vm2, %v888_v48 }
 0x185   : > { %2091 = vmatpush3.msra.mxu0 %v894_v50  ;;  %2096 = vmatpush3.msra.mxu1 %v1220_v51 }
 0x186   : > { %2092 = vmatprep.mubr.msk.f32.mxu0 %vm2389_vm1, %v2388_v2  ;;  %2097 = vmatprep.mubr.msk.f32.mxu1 %vm2389_vm1, %v2388_v2 }
 0x187   : > { %v890_v52 = vpop.permute.xlu0 %889  ;;  %2105 = vmatprep.subr.mxu1 %v2388_v2  ;;  %2100 = vmatprep.subr.mxu0 %v2388_v2 }
 0x188   : > { %2093 = vmatmul.mubr.msk.f32.vlgmr.msra.gmra.mrb[12].mxu0 %vm692_vm2, %v890_v52 }
 0x189   : > { %2102 = vmatprep.mubr.msk.f32.mxu0 %vm2389_vm1, %v2388_v2 }
 0x1e5   : > { %v964_v53 = vpop.f32.mrb[8].mxu0 }
 0x1e6   : > { %v2079_v54 = vpop.f32.mrb[9].mxu0  ;;  %v1184_v55 = vsel %vm692_vm2, %v964_v53, -inf }
 0x1e7   : > { %1185 = vmax.xlane.f32.xlu1 %v1184_v55 }
 0x1f8   : > { %785 = vrot.lane.b32.xlu1 %v775_v38, %s2391_s18  ;;  %s2396_s18 = smov 24  }
 0x257   : > { %v1036_v56 = vpop.f32.mrb[10].mxu0  ;;  %v1108_v57 = vpop.f32.mrb[0].mxu1 }
 0x258   : > { %v2084_v58 = vpop.f32.mrb[11].mxu0  ;;  %v2089_v59 = vpop.f32.mrb[1].mxu1  ;;  %v1187_v60 = vsel %vm692_vm2, %v1036_v56, -inf  ;;  %v1190_v63 = vsel %vm692_vm2, %v1108_v57, -inf }
 0x259   : > { %1188 = vmax.xlane.f32.xlu0 %v1187_v60 }
 0x25b   : > { %v1180_v61 = vpop.f32.mrb[12].mxu0 }
 0x25c   : > { %v2094_v62 = vpop.f32.mrb[13].mxu0  ;;  %v1193_v0 = vsel %vm692_vm2, %v1180_v61, -inf }
 0x25d   : > { %1191 = vmax.xlane.f32.xlu0 %v1190_v63  ;;  %1194 = vmax.xlane.f32.xlu1 %v1193_v0  ;;  %v1974_v62 = vld [vmem:[%s2856_s8] ss:$0 sm:$0xff] }
 0x26e   : > { %790 = vrot.lane.b32.xlu1 %v775_v38, %s2393_s26 }
 0x273   : > { %780 = vrot.lane.b32.xlu0 %v775_v38, %s2392_s30  ;;  %v1543_v38 = vld [vmem:[%s2855_s7 + $0x10] sm:$0xff] }
 0x274   : > { %v1186_v1 = vpop.xlane.xlu1 %1185  ;;  %v2188_v40 = vpack.c.bf16 %v1544_v39, %v1543_v38 }
 0x275   : > { %v1196_v3 = vsub.f32 %v964_v53, %v1186_v1 }
 0x277   : > { %v1200_v4 = vmul.f32 1.442695, %v1196_v3 }
 0x278   : > { %v786_v5 = vpop.permute.xlu1 %785 }
 0x279   : > { %2287 = vpow2.f32 %v1200_v4  ;;  %789 = vst.msk [vmem:[#allocation3 + $0x10] sm:$0xff] %vm692_vm2, %v786_v5 }
 0x280   : > { %v1222_v8 = vld [vmem:[#allocation3 + $0x10] sm:$0xff] }
 0x283   : > { %v2288_v6 = vpop.eup %2287 }
 0x284   : > { %2098 = vmatmul.mubr.msk.f32.vlgmr.msra.gmra.mrb[2].mxu1 %vm692_vm2, %v2288_v6  ;;  %v1208_v29 = vsel %vm692_vm2, %v2288_v6, 0.0 }
 0x285   : > { %2106 = vmatpush3.msra.mxu1 %v1222_v8  ;;  %2107 = vmatprep.mubr.msk.f32.mxu1 %vm2389_vm1, %v2388_v2 }
 0x286   : > { %2184 = vmatprep.subr.bf16.mxu1 %v2390_v12 }
 0x2e6   : > { %v1189_v9 = vpop.xlane.xlu0 %1188 }
 0x2e7   : > { %v1197_v10 = vsub.f32 %v1036_v56, %v1189_v9 }
 0x2e9   : > { %v1202_v11 = vmul.f32 1.442695, %v1197_v10 }
 0x2ea   : > { %v1192_v13 = vpop.xlane.xlu0 %1191  ;;  %v1195_v14 = vpop.xlane.xlu1 %1194 }
 0x2eb   : > { %2289 = vpow2.f32 %v1202_v11  ;;  %v1198_v15 = vsub.f32 %v1108_v57, %v1192_v13  ;;  %v1199_v16 = vsub.f32 %v1180_v61, %v1195_v14  ;;  %v1657_v11 = vld [vmem:[%s2859_s11 + $0x8] sm:$0xff]  ;;  %v1659_v14 = vld [vmem:[%s2859_s11 + $0x18] sm:$0xff] }
 0x2ed   : > { %v1204_v17 = vmul.f32 1.442695, %v1198_v15  ;;  %v1206_v18 = vmul.f32 1.442695, %v1199_v16  ;;  %v1741_v16 = vld [vmem:[%s2861_s13] sm:$0xff] }
 0x2ee   : > { %v781_v19 = vpop.permute.xlu0 %780  ;;  %v791_v20 = vpop.permute.xlu1 %790 }
 0x2ef   : > { %2291 = vpow2.f32 %v1204_v17  ;;  %784 = vst.msk [vmem:[#allocation3 + $0x8] sm:$0xff] %vm692_vm2, %v781_v19  ;;  %794 = vst.msk [vmem:[#allocation3 + $0x18] sm:$0xff] %vm692_vm2, %v791_v20  ;;  %v1742_v17 = vld [vmem:[%s2861_s13 + $0x8] sm:$0xff]  ;;  %v1744_v20 = vld [vmem:[%s2861_s13 + $0x18] sm:$0xff] }
 0x2f0   : > { %2293 = vpow2.f32 %v1206_v18  ;;  %v1743_v18 = vld [vmem:[%s2861_s13 + $0x10] sm:$0xff]  ;;  %v2197_v19 = vpack.c.bf16 %v1742_v17, %v1741_v16 }
 0x2f5   : > { %v2290_v21 = vpop.eup %2289 }
 0x2f6   : > { %v1211_v22 = vsel %vm692_vm2, %v2290_v21, 0.0  ;;  %v1221_v23 = vld [vmem:[#allocation3 + $0x8] sm:$0xff]  ;;  %v1223_v24 = vld [vmem:[#allocation3 + $0x18] sm:$0xff] }
 0x2f7   : > { %1212 = vadd.xlane.f32.xlu0 %v1211_v22  ;;  %2101 = vmatpush3.msra.mxu0 %v1221_v23  ;;  %v1745_v22 = vld [vmem:[%s2861_s13 + $0x20] sm:$0xff]  ;;  %v1746_v23 = vld [vmem:[%s2861_s13 + $0x28] sm:$0xff] }
 0x2f8   : > { %2103 = vmatmul.mubr.msk.f32.vlgmr.msra.gmra.mrb[14].mxu0 %vm692_vm2, %v2290_v21  ;;  %2110 = vmatprep.subr.mxu0 %v2388_v2  ;;  %v2200_v21 = vpack.c.bf16 %v1744_v20, %v1743_v18 }
 0x2f9   : > { %v2292_v25 = vpop.eup %2291  ;;  %2111 = vmatpush3.msra.mxu0 %v1223_v24  ;;  %2112 = vmatprep.mubr.msk.f32.mxu0 %vm2389_vm1, %v2388_v2  ;;  %v2203_v24 = vpack.c.bf16 %v1746_v23, %v1745_v22 }
 0x2fa   : > { %v2294_v26 = vpop.eup %2293  ;;  %2108 = vmatmul.mubr.msk.f32.vlgmr.msra.gmra.mrb[4].mxu1 %vm692_vm2, %v2292_v25  ;;  %v1214_v27 = vsel %vm692_vm2, %v2292_v25, 0.0  ;;  %2190 = vmatprep.subr.bf16.mxu0 %v2390_v12  ;;  %v1747_v25 = vld [vmem:[%s2861_s13 + $0x30] sm:$0xff] }
 0x2fb   : > { %1215 = vadd.xlane.f32.xlu1 %v1214_v27  ;;  %v1217_v28 = vsel %vm692_vm2, %v2294_v26, 0.0  ;;  %2123 = vmatprep.mubr.msk.f32.mxu1 %vm2389_vm1, %v2388_v2 }
 0x2fc   : > { %1218 = vadd.xlane.f32.xlu0 %v1217_v28  ;;  %2113 = vmatmul.mubr.msk.f32.vlgmr.msra.gmra.mrb[16].mxu0 %vm692_vm2, %v2294_v26  ;;  %v1748_v26 = vld [vmem:[%s2861_s13 + $0x38] sm:$0xff]  ;;  %v1749_v28 = vld [vmem:[%s2861_s13 + $0x40] sm:$0xff] }
 0x2fd   : > { %2134 = vmatprep.mubr.msk.f32.mxu0 %vm2389_vm1, %v2388_v2  ;;  %2186 = vmatpush3.bf16.msra.mxu1 %v2185_v32  ;;  %v2206_v27 = vpack.c.bf16 %v1748_v26, %v1747_v25  ;;  %v1752_v32 = vld [vmem:[%s2861_s13 + $0x58] sm:$0xff] }
 0x2fe   : > { %2187 = vmatprep.subr.bf16.mxu1 %v2390_v12 }
 0x300   : > { %1209 = vadd.xlane.f32.xlu0 %v1208_v29  ;;  %v1750_v29 = vld [vmem:[%s2861_s13 + $0x48] sm:$0xff] }
 0x301   : > { %2189 = vmatpush3.bf16.msra.mxu1 %v2188_v40  ;;  %v2209_v30 = vpack.c.bf16 %v1750_v29, %v1749_v28 }
 0x302   : > { %2196 = vmatprep.subr.bf16.mxu1 %v2390_v12 }
 0x357   : > { %v1293_v33 = vpop.f32.mrb[2].mxu1 }
 0x358   : > { %v2099_v34 = vpop.f32.mrb[3].mxu1 }
 0x359   : > { %v1753_v34 = vld [vmem:[%s2861_s13 + $0x60] sm:$0xff] }
 0x384   : > { %v1213_v35 = vpop.xlane.xlu0 %1212 }
 0x385   : > { %2295 = vrcp.f32 %v1213_v35  ;;  %v1754_v35 = vld [vmem:[%s2861_s13 + $0x68] sm:$0xff] }
 0x388   : > { %v1216_v36 = vpop.xlane.xlu1 %1215 }
 0x389   : > { %v1219_v37 = vpop.xlane.xlu0 %1218  ;;  %2297 = vrcp.f32 %v1216_v36  ;;  %v2215_v36 = vpack.c.bf16 %v1754_v35, %v1753_v34 }
 0x38a   : > { %2299 = vrcp.f32 %v1219_v37 }
 0x38d   : > { %v1210_v53 = vpop.xlane.xlu0 %1209 }
 0x38e   : > { %2301 = vrcp.f32 %v1210_v53  ;;  %v1980_v53 = vld [vmem:[%s2862_s14] ss:$0 sm:$0xff] }
 0x38f   : > { %v2296_v41 = vpop.eup %2295 }
 0x393   : > { %v2298_v45 = vpop.eup %2297 }
 0x394   : > { %v2300_v49 = vpop.eup %2299 }
 0x398   : > { %v2302_v54 = vpop.eup %2301 }
 0x399   : > { %v1520_v55 = vmul.f32 %v2302_v54, %v1293_v33  ;;  %v2212_v33 = vpack.c.bf16 %v1752_v32, %v1751_v31 }
 0x3cb   : > { %v1366_v42 = vpop.f32.mrb[14].mxu0 }
 0x3cc   : > { %v1521_v43 = vmul.f32 %v2296_v41, %v1366_v42  ;;  %v2104_v44 = vpop.f32.mrb[15].mxu0  ;;  %v1976_v41 = vld [vmem:[%s2857_s9] ss:$0 sm:$0xff] }
 0x3cd   : > { %v1439_v46 = vpop.f32.mrb[4].mxu1 }
 0x3ce   : > { %v1522_v47 = vmul.f32 %v2298_v45, %v1439_v46  ;;  %v2109_v48 = vpop.f32.mrb[5].mxu1  ;;  %1525 = vrot.lane.b32.xlu1 %v1521_v43, %s2394_s23  ;;  %v1977_v43 = vld [vmem:[%s2858_s10] ss:$0 sm:$0xff]  ;;  %v1756_v46 = vld [vmem:[%s2861_s13 + $0x78] sm:$0xff]  ;;  %s2894_s23 = sld [smem:[#allocation18_spill]] }
 0x3cf   : > { %v1512_v50 = vpop.f32.mrb[16].mxu0  ;;  %v1978_v48 = vld [vmem:[%s2860_s12] ss:$0 sm:$0xff] }
 0x3d0   : > { %v1523_v51 = vmul.f32 %v2300_v49, %v1512_v50  ;;  %1529 = vrot.lane.b32.xlu0 %v1522_v47, %s2395_s0  ;;  %v2114_v52 = vpop.f32.mrb[17].mxu0  ;;  %s551_s0 = sand.u32 1, %s2369_s25  }
 0x3d1   : > { %s1866_s30 = scalar_lea.sflag [#allocation5], %s551_s0 }
 0x3d2   : > { %1533 = vrot.lane.b32.xlu1 %v1523_v51, %s2396_s18  ;;  %s1955_s18 = sshll.u32 %s551_s0, 3 }
 0x3d3   : > { %s553_s21 = scalar_lea.vmem [#allocation4], %s1955_s18  ;;  %s2311_s18 = sshll.u32 %s2397_s27, 4  ;;  %s2312_s18 = int_to_ptr.vmem [resolvable:$false] %s2311_s18 }
 0x3d4   : > { %s1880_s22 = sshll.u32 %s553_s21, 4  ;;  %s2800_s2 = scalar_lea.hbm %s2894_s23, %s1984_s29  ;;  %s2802_s22 = int_to_ptr.vmem [resolvable:$true] %s1880_s22 }
 0x3d5   : > { %s2307_s26 = scalar_lea.vmem %s2802_s22, 128  ;;  %s2313_s28 = scalar_lea.vmem %s2312_s18, 256 }
 0x3d6   : > { %p2308_p12 = scmp.ne.s32.totalorder %s2802_s22, %s2307_s26  ;;  %p2314_p1 = scmp.lt.s32.totalorder %s2802_s22, %s2312_s18 }
 0x3d7   : > { %p2315_p2 = scmp.lt.s32.totalorder %s2313_s28, %s2307_s26 }
 0x3d8   : > { %p2309_p13 = pnand %p2308_p12, %p2528_p4 }
 0x3d9   : > { %p2316_p3 = por %p2315_p2, %p2314_p1 }
 0x3da   : > { %p2310_p0 = pneg %p2309_p13 }
 0x3dc   : > { %p2317_p5 = pnand %p2316_p3, %p2310_p0 }
 0x440   : > { %v1526_v56 = vpop.permute.xlu1 %1525 }
 0x441   : > { %v1536_v57 = vsel %vm692_vm2, %v1520_v55, %v1526_v56 }
 0x442   : > { %v1530_v58 = vpop.permute.xlu0 %1529 }
 0x443   : > { %v1538_v59 = vsel %vm1537_vm3, %v1536_v57, %v1530_v58 }
 0x444   : > { %v1534_v60 = vpop.permute.xlu1 %1533 }
 0x445   : > { %v1540_v61 = vsel %vm1539_vm4, %v1538_v59, %v1534_v60 }
 0x446   : > { %2124 = vmatmul.mubr.msk.f32.vlgmr.msra.gmra.mrb[6].mxu1 %vm591_vm0, %v1540_v61 }
 0x447   : > { %2169 = vmatprep.mubr.msk.f32.mxu1 %vm2389_vm1, %v2388_v2  ;;  %v1656_v2 = vld [vmem:[%s2859_s11] sm:$0xff]  ;;  %2198 = vmatpush3.bf16.msra.mxu1 %v2197_v19 }
 0x448   : > { %v2191_v13 = vpack.c.bf16 %v1657_v11, %v1656_v2  ;;  %2199 = vmatprep.subr.bf16.mxu1 %v2390_v12 }
 0x44a   : > { %2192 = vmatpush3.bf16.msra.mxu0 %v2191_v13 }
 0x44b   : > { %2193 = vmatprep.subr.bf16.mxu0 %v2390_v12  ;;  %2201 = vmatpush3.bf16.msra.mxu1 %v2200_v21 }
 0x44c   : > { %2202 = vmatprep.subr.bf16.mxu1 %v2390_v12 }
 0x44f   : > { %2204 = vmatpush3.bf16.msra.mxu1 %v2203_v24 }
 0x450   : > { %2205 = vmatprep.subr.bf16.mxu1 %v2390_v12 }
 0x453   : > { %2207 = vmatpush3.bf16.msra.mxu1 %v2206_v27 }
 0x454   : > { %2208 = vmatprep.subr.bf16.mxu1 %v2390_v12 }
 0x457   : > { %2210 = vmatpush3.bf16.msra.mxu1 %v2209_v30 }
 0x458   : > { %2211 = vmatprep.subr.bf16.mxu1 %v2390_v12 }
 0x45b   : > { %2213 = vmatpush3.bf16.msra.mxu1 %v2212_v33 }
 0x45c   : > { %2214 = vmatprep.subr.bf16.mxu1 %v2390_v12 }
 0x45f   : > { %2216 = vmatpush3.bf16.msra.mxu1 %v2215_v36 }
 0x460   : > { %2217 = vmatprep.subr.bf16.mxu1 %v2390_v12  ;;  %v1755_v12 = vld [vmem:[%s2861_s13 + $0x70] sm:$0xff] }
 0x461   : > { %v2218_v47 = vpack.c.bf16 %v1756_v46, %v1755_v12 }
 0x463   : > { %2219 = vmatpush3.bf16.msra.mxu1 %v2218_v47 }
 0x519   : > { %v1621_v63 = vpop.f32.mrb[6].mxu1 }
 0x51a   : > { %v1622_v0 = vadd.f32 %v1974_v62, %v1621_v63  ;;  %v2125_v1 = vpop.f32.mrb[7].mxu1 }
 0x51c   : > { %v1625_v3 = vadd.f32 %v1622_v0, %v2567_v7  ;;  %v1658_v7 = vld [vmem:[%s2859_s11 + $0x10] sm:$0xff] }
 0x51d   : > { %v2194_v15 = vpack.c.bf16 %v1659_v14, %v1658_v7 }
 0x51e   : > { %v1628_v4 = vsel %vm591_vm0, %v1625_v3, 0.0 }
 0x51f   : > { %1629 = vadd.xlane.f32.xlu1 %v1628_v4  ;;  %2195 = vmatpush3.bf16.msra.mxu0 %v2194_v15 }
 0x5ac   : > { %v1630_v5 = vpop.xlane.xlu1 %1629 }
 0x5ad   : > { %v1632_v6 = vmul.f32 0.03125, %v1630_v5  ;;  %v1981_v5 = vld [vmem:[%s2863_s15] ss:$0 sm:$0xff] }
 0x5af   : > { %v1633_v8 = vsub.f32 %v1625_v3, %v1632_v6 }
 0x5b1   : > { %v1634_v9 = vmul.f32 %v1633_v8, %v1633_v8 }
 0x5b3   : > { %v1635_v10 = vsel %vm591_vm0, %v1634_v9, 0.0 }
 0x5b4   : > { %1636 = vadd.xlane.f32.xlu0 %v1635_v10 }
 0x641   : > { %v1637_v37 = vpop.xlane.xlu0 %1636 }
 0x642   : > { %v1638_v38 = vmul.f32 0.03125, %v1637_v37 }
 0x644   : > { %v1639_v39 = vadd.f32 1e-05, %v1638_v38 }
 0x646   : > { %2303 = vrsqrt.f32 %v1639_v39 }
 0x650   : > { %v2304_v40 = vpop.eup %2303 }
 0x651   : > { %v1641_v42 = vmul.f32 %v2304_v40, %v1633_v8  ;;  %v1982_v8 = vld [vmem:[%s2893_s24] ss:$0 sm:$0xff] }
 0x653   : > { %v1648_v44 = vmul.f32 %v1976_v41, %v1641_v42 }
 0x655   : > { %v1655_v45 = vadd.f32 %v1977_v43, %v1648_v44 }
 0x657   : > { %2135 = vmatmul.mubr.msk.f32.vlgmr.msra.gmra.mrb[18].mxu0 %vm591_vm0, %v1655_v45 }
 0x72a   : > { %v1736_v49 = vpop.f32.mrb[18].mxu0 }
 0x72b   : > { %v1737_v50 = vadd.f32 %v1978_v48, %v1736_v49  ;;  %v2136_v51 = vpop.f32.mrb[19].mxu0 }
 0x72d   : > { %v1740_v52 = vmax.f32 %v1737_v50, 0.0 }
 0x72f   : > { %2170 = vmatmul.mubr.f32.vlgmr.msra.gmra.mrb[8].mxu1 %v1740_v52 }
 0x802   : > { %v1830_v54 = vpop.f32.mrb[8].mxu1 }
 0x803   : > { %v1831_v55 = vadd.f32 %v1980_v53, %v1830_v54  ;;  %v2171_v56 = vpop.f32.mrb[9].mxu1 }
 0x805   : > { %v1834_v57 = vadd.f32 %v1831_v55, %v1655_v45 }
 0x807   : > { %v1837_v58 = vsel %vm591_vm0, %v1834_v57, 0.0 }
 0x808   : > { %1838 = vadd.xlane.f32.xlu0 %v1837_v58 }
 0x895   : > { %v1839_v59 = vpop.xlane.xlu0 %1838 }
 0x896   : > { %v1840_v60 = vmul.f32 0.03125, %v1839_v59 }
 0x898   : > { %v1841_v61 = vsub.f32 %v1834_v57, %v1840_v60 }
 0x89a   : > { %v1842_v62 = vmul.f32 %v1841_v61, %v1841_v61 }
 0x89c   : > { %v1843_v63 = vsel %vm591_vm0, %v1842_v62, 0.0 }
 0x89d   : > { %1844 = vadd.xlane.f32.xlu1 %v1843_v63 }
 0x92a   : > { %v1845_v0 = vpop.xlane.xlu1 %1844 }
 0x92b   : > { %v1846_v1 = vmul.f32 0.03125, %v1845_v0 }
 0x92d   : > { %v1847_v3 = vadd.f32 1e-05, %v1846_v1 }
 0x92f   : > { %2305 = vrsqrt.f32 %v1847_v3 }
 0x939   : > { %v2306_v4 = vpop.eup %2305 }
 0x93a   : > { %v1849_v6 = vmul.f32 %v2306_v4, %v1841_v61 }
 0x93c   : > { %v1856_v9 = vmul.f32 %v1981_v5, %v1849_v6 }
 0x93e   : > { %v1863_v10 = vadd.f32 %v1982_v8, %v1856_v9 }
 0x940   : > { %1864 = vst.msk [vmem:[%s553_s21] sm:$0xff] %vm591_vm0, %v1863_v10 }
 0x941   : > { %2320 = shalt.err (!%p2317_p5)
}
 0x942   : > { %s2321_s0 = scalar_lea.hbm %s2800_s2, 128  ;;  %s2325_s29 = scalar_lea.hbm %s2894_s23, 256 }
 0x943   : > { %p2322_p6 = scmp.ne.s32.totalorder %s2800_s2, %s2321_s0  ;;  %p2326_p10 = scmp.lt.u32.totalorder %s2800_s2, %s2894_s23 }
 0x944   : > { %p2327_p11 = scmp.lt.u32.totalorder %s2325_s29, %s2321_s0  ;;  %p2329_p13 = scmp.lt.u32.totalorder %s2321_s0, %s2800_s2 }
 0x945   : > { %p2323_p7 = pnand %p2322_p6, %p2528_p4 }
 0x946   : > { %p2328_p12 = por %p2327_p11, %p2326_p10 }
 0x947   : > { %p2324_p9 = pneg %p2323_p7 }
 0x948   : > { %p2330_p0 = por %p2329_p13, %p2328_p12 }
 0x94a   : > { %p2331_p1 = pnand %p2330_p0, %p2324_p9 }
 0x94c   : > { %2334 = shalt.err (!%p2331_p1)
}
 0x94d   : > { %2220 = dma.vmem_to_hbm [thread:$0]  (%p2528_p4), %s2802_s22, 128, %s2800_s2, %s1866_s30  }
 0x94e PF: > { %s2895_s20 = sld [smem:[#allocation10_spill]]  ;;  %s2896_s26 = sld [smem:[#allocation7_spill]] }
 0x954   : > { %p2226_p2 = scmp.ge.s32.totalorder %s2895_s20, 2  ;;  %s1892_s18 = sand.u32 1, %s2896_s26  }
 0x955   : > { %s1893_s28 = scalar_lea.sflag [#allocation5], %s1892_s18 }
 0x956   : > { %p2223_p3 = pnand %p2226_p2, %p2535_p8 }
 0x958   : > { %2360 = dma.done.wait (!%p2223_p3), %s1893_s28, 128  }
 0x959   : > { %2362 = vsyncadd (!%p2223_p3), %s1893_s28, 4294967168  ;;  %s30_s29 = sadd.s32 1, %s2895_s20   ;;  %s2898_s0 = sld [smem:[#allocation8_spill]] }
 0x95a   : > { %p27_p5 = scmp.ge.s32.totalorder %s30_s29, 4   ;;  %s2899_s26 = sld [smem:[#allocation13_spill]] }
 0x95b   : > { %s2900_s27 = sld [smem:[#allocation9_spill]]  ;;  %s2901_s28 = sld [smem:[#allocation11_spill]] }
 0x95c   : > { %s2902_s24 = smov %s2369_s25  ;;  %29 = sbr.rel (!%p27_p5) target bundleno = 10 (0xa), region = 131 }
 0x95f   : > { %s2903_s25 = smov %s2898_s0 }
 0x963   :  { %1898 = vsyncpa [#allocation5], 1 }
 0x964   :  { %1900 = vsyncpa [#allocation5 + $0x1], 1 }

</bundles_post_ra>
